<compile_context>
chip_gen: v7x
topology: tpu7x:2x2x1
jax: 0.10.0
libtpu: 0.0.40
codegen_flags: <defaults>
</compile_context>

<pallas_src>
import functools

import jax
import jax.numpy as jnp
from jax import lax
from jax.experimental import pallas as pl
from jax.experimental.pallas import tpu as pltpu
import numpy as np


def tagger_kernel(x_ref,      # (T, TB, 2D) bf16: [:, :, :D]=emb(t), [:, :, D:]=emb(T-1-t)
                  wih_ref,    # (2D, 8H)    bf16 block-structured input projection
                  b_ref,      # (1, 8H)     f32 folded LSTM bias, both directions
                  whh_ref,    # (2H, 8H)    bf16 block-diagonal recurrent weights
                  w1_ref,     # (2H, 2H)    bf16 Linear1 weight, pre-transposed
                  b1_ref,     # (1, 2H)     f32
                  w2_ref,     # (2H, NTp)   bf16 Linear2 weight, pre-transposed + lane-padded
                  b2_ref,     # (1, NTp)    f32
                  out_ref,    # (T, TB, NTp) f32 logits (lane-dense)
                  gx_ref,     # VMEM scratch (T, TB, 8H) f32: hoisted merged gate inputs
                  *, T, TB, H):
    # ---- Hoisted, pre-merged input projection (off the recurrent critical path). ----
    # gx[t] fwd columns = Wih_f @ emb(t), bwd columns = Wih_b @ emb(T-1-t).
    wih = wih_ref[...]
    b = b_ref[...]
    for t in range(T):
        gx_ref[t] = jnp.dot(x_ref[t], wih, preferred_element_type=jnp.float32) + b

    # Lane-constant vectors for the single-tanh activation.  Column layout is
    # [i_f,i_b,f_f,f_b,g_f,g_b,o_f,o_b]; sigmoid(x) = 0.5*tanh(0.5*x) + 0.5 on i/f/o lanes.
    lanes = lax.broadcasted_iota(jnp.int32, (TB, 8 * H), 1)
    is_g = (lanes >= 4 * H) & (lanes < 6 * H)
    alpha = jnp.where(is_g, 1.0, 0.5)      # tanh pre-scale == post-scale
    beta = jnp.where(is_g, 0.0, 0.5)       # post-offset

    # At H=32/T=8 the resident bf16 whh (~8 vregs) + unrolled live h's fit comfortably;
    # if H or T grows, read whh_ref directly in the dot / re-roll the loop (vreg pressure).
    whh = whh_ref[...]

    h = jnp.zeros((TB, 2 * H), jnp.float32)     # [h_f(s) | h_b(T-1-s)]
    c = jnp.zeros((TB, 2 * H), jnp.float32)     # [c_f    | c_b       ]
    h_steps = [None] * T

    # ---- Fused, fully-unrolled bidirectional recurrence (static offsets). ----
    for s in range(T):
        gates = gx_ref[s] + jnp.dot(h.astype(jnp.bfloat16), whh,
                                    preferred_element_type=jnp.float32)   # (TB, 8H) f32
        # One full-tile tanh per step; VPU does the rest.
        act = alpha * jnp.tanh(alpha * gates) + beta
        i = act[:, 0 * H:2 * H]                 # [i_f | i_b]
        f = act[:, 2 * H:4 * H]                 # [f_f | f_b]
        g = act[:, 4 * H:6 * H]                 # [g_f | g_b]
        o = act[:, 6 * H:8 * H]                 # [o_f | o_b]
        c = f * c + i * g                       # lane-aligned carries
        h = o * jnp.tanh(c)
        h_steps[s] = h                          # stays in vregs (loop is fully unrolled)

    # Dropout(p=0.3) is identity at inference.
    # TODO(synk): training-mode stochastic dropout not applied (eval semantics only).

    # ---- MLP head; hs assembled from registers (no scratch round-trip). ----
    fwd_lane = lax.broadcasted_iota(jnp.int32, (TB, 2 * H), 1) < H
    hs = jnp.concatenate(
        [jnp.where(fwd_lane, h_steps[t], h_steps[T - 1 - t]) for t in range(T)],
        axis=0)                                 # (T*TB, 2H): [h_fwd(t) | h_bwd(t)] per block
    h1 = jnp.maximum(
        jnp.dot(hs.astype(jnp.bfloat16), w1_ref[...],
                preferred_element_type=jnp.float32) + b1_ref[...], 0.0)    # (T*TB, 2H)
    logits = (jnp.dot(h1.astype(jnp.bfloat16), w2_ref[...],
                      preferred_element_type=jnp.float32) + b2_ref[...])   # (T*TB, NTp)
    for t in range(T):                          # full-vreg, lane-dense stores (NTp = 128k)
        out_ref[t] = logits[t * TB:(t + 1) * TB, :].astype(out_ref.dtype)


def init_params(key, dimensions, n_words, n_tags):
    D = dimensions
    H = D
    ks = jax.random.split(key, 12)
    k_lstm = 1.0 / np.sqrt(H)
    k_lin1 = 1.0 / np.sqrt(2 * D)
    k_lin2 = 1.0 / np.sqrt(2 * D)

    emb = jax.random.normal(ks[0], (n_words, D), jnp.float32)
    emb = emb.at[0].set(0.0)                                   # padding_idx=0 -> zero row

    def u(k, shape, bound):
        return jax.random.uniform(k, shape, jnp.float32, -bound, bound)

    params = dict(
        embedding=emb,
        # forward LSTM (bias_ih + bias_hh folded); PyTorch layouts, gate order i,f,g,o
        wih_f=u(ks[1], (4 * H, D), k_lstm),
        whh_f=u(ks[2], (4 * H, H), k_lstm),
        b_f=(u(ks[3], (1, 4 * H), k_lstm) + u(ks[4], (1, 4 * H), k_lstm)),
        # backward LSTM
        wih_b=u(ks[5], (4 * H, D), k_lstm),
        whh_b=u(ks[6], (4 * H, H), k_lstm),
        b_b=(u(ks[7], (1, 4 * H), k_lstm) + u(ks[8], (1, 4 * H), k_lstm)),
        # MLP head
        w1=u(ks[9], (2 * D, 2 * D), k_lin1),
        b1=u(ks[10], (1, 2 * D), k_lin1),
        w2=u(ks[11], (n_tags, 2 * D), k_lin2),
        b2=jnp.zeros((1, n_tags), jnp.float32),
    )
    return params


def _pack_weights(params, D, H, n_tags, NTp):
    """One-time weight packing: gate-interleaved, pre-transposed, bf16 MXU operands."""
    f32 = jnp.float32

    def interleave(a, b):
        # (K, 4H) x 2 -> (K, 8H) with column blocks [a_i,b_i,a_f,b_f,a_g,b_g,a_o,b_o]
        K = a.shape[0]
        return jnp.stack([a.reshape(K, 4, H), b.reshape(K, 4, H)], axis=2).reshape(K, 8 * H)

    zD = jnp.zeros((D, 4 * H), f32)
    zH = jnp.zeros((H, 4 * H), f32)
    # Input projection: rows 0:D act on emb(t) -> fwd gate columns,
    #                   rows D:2D act on emb(T-1-t) -> bwd gate columns.
    wih_pack = jnp.concatenate([interleave(params["wih_f"].T, zD),
                                interleave(zD, params["wih_b"].T)], axis=0)    # (2D, 8H)
    # Block-diagonal recurrence: h_f -> fwd columns, h_b -> bwd columns.
    whh_pack = jnp.concatenate([interleave(params["whh_f"].T, zH),
                                interleave(zH, params["whh_b"].T)], axis=0)    # (2H, 8H)
    b_cat = interleave(params["b_f"], params["b_b"])                           # (1, 8H)

    w1_t = params["w1"].T                                                      # (2H, 2H)
    w2_t = jnp.zeros((2 * H, NTp), f32).at[:, :n_tags].set(params["w2"].T)
    b2_p = jnp.zeros((1, NTp), f32).at[:, :n_tags].set(params["b2"])

    return (wih_pack.astype(jnp.bfloat16), whh_pack.astype(jnp.bfloat16), b_cat,
            w1_t.astype(jnp.bfloat16), params["b1"], w2_t.astype(jnp.bfloat16), b2_p)


def _vmem_limit_bytes(T, TB, D, H, NTp):
    """Size the scoped-VMEM request from the actual footprint (matters on v5e: 16 MiB default)."""
    x_blk = T * TB * (2 * D) * 2                 # bf16 input block
    out_blk = T * TB * NTp * 4                   # f32 output block
    gx = T * TB * (8 * H) * 4                    # f32 scratch
    weights = ((2 * D) * (8 * H) + (2 * H) * (8 * H)
               + (2 * H) * (2 * H) + (2 * H) * NTp) * 2
    biases = (8 * H + 2 * H + NTp) * 4
    need = 2 * (x_blk + out_blk + weights + biases) + gx   # double-buffered blocks
    return int(min(max(4 * need + (2 << 20), 8 << 20), 96 << 20))


def tagger_forward(words, params, n_tags):
    # words: (B, T) int32
    B, T = words.shape
    D = params["embedding"].shape[1]
    H = D
    Bp = ((B + 7) // 8) * 8                    # sublane-pad batch
    if Bp > 128:                               # grow M toward the MXU tile before gridding
        TILE_B = 128
        Bp = ((Bp + 127) // 128) * 128
    else:
        TILE_B = Bp
    NTp = ((n_tags + 127) // 128) * 128        # lane-pad tag dimension

    # Time-major embedding gather, batch-padded; x2[t] = [emb(t) | emb(T-1-t)] so a single
    # hoisted matmul against the block-structured Wih yields the pre-merged gate inputs.
    emb_tm = jnp.take(params["embedding"], words.T, axis=0)            # (T, B, D)
    emb_p = jnp.zeros((T, Bp, D), jnp.float32).at[:, :B, :].set(emb_tm)
    x2 = jnp.concatenate([emb_p, emb_p[::-1]], axis=-1).astype(jnp.bfloat16)  # (T, Bp, 2D)

    wih_pack, whh_pack, b_cat, w1_t, b1, w2_t, b2_p = _pack_weights(params, D, H, n_tags, NTp)

    kernel = functools.partial(tagger_kernel, T=T, TB=TILE_B, H=H)
    grid = (Bp // TILE_B,)                     # batch row-blocks; independent per block

    out = pl.pallas_call(
        kernel,
        out_shape=jax.ShapeDtypeStruct((T, Bp, NTp), jnp.float32),
        grid=grid,
        in_specs=[
            pl.BlockSpec((T, TILE_B, 2 * D), lambda b: (0, b, 0)),   # x2: batch-sharded
            pl.BlockSpec((2 * D, 8 * H), lambda b: (0, 0)),          # wih
            pl.BlockSpec((1, 8 * H), lambda b: (0, 0)),              # lstm bias
            pl.BlockSpec((2 * H, 8 * H), lambda b: (0, 0)),          # whh
            pl.BlockSpec((2 * H, 2 * H), lambda b: (0, 0)),          # w1
            pl.BlockSpec((1, 2 * H), lambda b: (0, 0)),              # b1
            pl.BlockSpec((2 * H, NTp), lambda b: (0, 0)),            # w2
            pl.BlockSpec((1, NTp), lambda b: (0, 0)),                # b2
        ],
        out_specs=pl.BlockSpec((T, TILE_B, NTp), lambda b: (0, b, 0)),
        scratch_shapes=[
            # TODO(synk): store gx in bf16 / row-block the head when scaling T*B on v7x (64 MiB VMEM).
            pltpu.VMEM((T, TILE_B, 8 * H), jnp.float32),
        ],
        compiler_params=pltpu.CompilerParams(
            dimension_semantics=("parallel",),          # v7x: batch shards on both TCs
            vmem_limit_bytes=_vmem_limit_bytes(T, TILE_B, D, H, NTp),
        ),
    )(x2, wih_pack, b_cat, whh_pack, w1_t, b1, w2_t, b2_p)

    out = out[:, :B, :n_tags]                                        # (T, B, n_tags)
    return jnp.transpose(out, (1, 0, 2))                             # (B, T, n_tags)


def tagger_reference(words, params, n_tags):
    """Pure-JAX f32 mirror of the PyTorch module (eval mode) for correctness checking."""
    B, T = words.shape
    D = params["embedding"].shape[1]
    H = D
    emb = jnp.take(params["embedding"], words, axis=0)               # (B, T, D)

    def cell(x_t, h, c, wih, whh, b):
        gates = x_t @ wih.T + h @ whh.T + b
        i = jax.nn.sigmoid(gates[:, 0 * H:1 * H])
        f = jax.nn.sigmoid(gates[:, 1 * H:2 * H])
        g = jnp.tanh(gates[:, 2 * H:3 * H])
        o = jax.nn.sigmoid(gates[:, 3 * H:4 * H])
        c = f * c + i * g
        return o * jnp.tanh(c), c

    h = jnp.zeros((B, H)); c = jnp.zeros((B, H)); hf = []
    for t in range(T):
        h, c = cell(emb[:, t], h, c, params["wih_f"], params["whh_f"], params["b_f"])
        hf.append(h)
    h = jnp.zeros((B, H)); c = jnp.zeros((B, H)); hb = [None] * T
    for t in range(T - 1, -1, -1):
        h, c = cell(emb[:, t], h, c, params["wih_b"], params["whh_b"], params["b_b"])
        hb[t] = h
    seq = jnp.concatenate([jnp.stack(hf, 1), jnp.stack(hb, 1)], axis=-1)  # (B, T, 2H)
    h1 = jnp.maximum(seq @ params["w1"].T + params["b1"], 0.0)
    return h1 @ params["w2"].T + params["b2"]


if __name__ == "__main__":
    dimensions = 32
    n_words = 50
    n_tags = 10
    B, T = 2, 8

    key = jax.random.PRNGKey(0)
    k_params, k_words = jax.random.split(key)
    params = init_params(k_params, dimensions, n_words, n_tags)

    words = jax.random.randint(k_words, (B, T), 0, n_words, dtype=jnp.int32)
    words = words.at[:, -2:].set(0)  # a couple of padding tokens (padding_idx=0)

    preds = tagger_forward(words, params, n_tags)
    preds = jax.block_until_ready(preds)

    assert preds.shape == (B, T, n_tags), preds.shape
    assert bool(jnp.all(jnp.isfinite(preds)))

    ref = jax.block_until_ready(tagger_reference(words, params, n_tags))
    max_err = float(jnp.max(jnp.abs(preds - ref)))
    # Tolerance loosened vs pure-f32 because MXU operands are bf16 (review-approved trade).
    assert max_err < 3e-2, f"mismatch vs reference: {max_err}"

    print("KERNEL_OK")
</pallas_src>

<mosaic_0001>
module attributes {stable_mosaic.version = 11 : i64} {
  func.func @tagger_kernel(%arg0: i32, %arg1: memref<8x8x64xbf16, #tpu.memory_space<vmem>>, %arg2: memref<64x256xbf16, #tpu.memory_space<vmem>>, %arg3: memref<1x256xf32, #tpu.memory_space<vmem>>, %arg4: memref<64x256xbf16, #tpu.memory_space<vmem>>, %arg5: memref<64x64xbf16, #tpu.memory_space<vmem>>, %arg6: memref<1x64xf32, #tpu.memory_space<vmem>>, %arg7: memref<64x128xbf16, #tpu.memory_space<vmem>>, %arg8: memref<1x128xf32, #tpu.memory_space<vmem>>, %arg9: memref<8x8x128xf32, #tpu.memory_space<vmem>>, %arg10: memref<8x8x256xf32, #tpu.memory_space<vmem>>) attributes {dimension_semantics = [#tpu.dimension_semantics<parallel>], iteration_bounds = array<i64: 1>, scalar_prefetch = 0 : i64, scratch_operands = 1 : i64, tpu.core_type = #tpu.core_type<tc>, window_params = [{transform_indices = @transform_0, window_bounds = array<i64: 8, 8, 64>}, {pipeline_mode = #tpu.pipeline_mode<synchronous>, transform_indices = @transform_1, window_bounds = array<i64: 64, 256>}, {pipeline_mode = #tpu.pipeline_mode<synchronous>, transform_indices = @transform_2, window_bounds = array<i64: 1, 256>}, {pipeline_mode = #tpu.pipeline_mode<synchronous>, transform_indices = @transform_3, window_bounds = array<i64: 64, 256>}, {pipeline_mode = #tpu.pipeline_mode<synchronous>, transform_indices = @transform_4, window_bounds = array<i64: 64, 64>}, {pipeline_mode = #tpu.pipeline_mode<synchronous>, transform_indices = @transform_5, window_bounds = array<i64: 1, 64>}, {pipeline_mode = #tpu.pipeline_mode<synchronous>, transform_indices = @transform_6, window_bounds = array<i64: 64, 128>}, {pipeline_mode = #tpu.pipeline_mode<synchronous>, transform_indices = @transform_7, window_bounds = array<i64: 1, 128>}, {transform_indices = @transform_8, window_bounds = array<i64: 8, 8, 128>}]} {
    %c0 = arith.constant 0 : index
    %c0_0 = arith.constant 0 : index
    %0 = vector.load %arg2[%c0, %c0_0] : memref<64x256xbf16, #tpu.memory_space<vmem>>, vector<64x256xbf16>
    %c0_1 = arith.constant 0 : index
    %c0_2 = arith.constant 0 : index
    %1 = vector.load %arg3[%c0_1, %c0_2] : memref<1x256xf32, #tpu.memory_space<vmem>>, vector<1x256xf32>
    %c0_3 = arith.constant 0 : index
    %c0_4 = arith.constant 0 : index
    %c0_5 = arith.constant 0 : index
    %2 = vector.load %arg1[%c0_3, %c0_4, %c0_5] : memref<8x8x64xbf16, #tpu.memory_space<vmem>>, vector<1x8x64xbf16>
    %3 = vector.shape_cast %2 : vector<1x8x64xbf16> to vector<8x64xbf16>
    %cst = arith.constant dense<0.000000e+00> : vector<8x256xf32>
    %4 = tpu.matmul %3, %0, %cst {dimension_numbers = #tpu.dot_dimension_numbers<[1], [0], [0], [1], [0, 0, 1, 1], [], []>} : vector<8x64xbf16>, vector<64x256xbf16>, vector<8x256xf32> -> vector<8x256xf32>
    %5 = vector.broadcast %1 : vector<1x256xf32> to vector<8x256xf32>
    %6 = arith.addf %4, %5 : vector<8x256xf32>
    %c0_6 = arith.constant 0 : index
    %c0_7 = arith.constant 0 : index
    %c0_8 = arith.constant 0 : index
    %7 = vector.load %arg10[%c0_6, %c0_7, %c0_8] : memref<8x8x256xf32, #tpu.memory_space<vmem>>, vector<1x8x256xf32>
    %8 = vector.shape_cast %7 : vector<1x8x256xf32> to vector<8x256xf32>
    %9 = vector.shape_cast %6 : vector<8x256xf32> to vector<1x8x256xf32>
    tpu.vector_store %arg10[%c0_6, %c0_7, %c0_8], %9 {strides = array<i32>} : memref<8x8x256xf32, #tpu.memory_space<vmem>>, vector<1x8x256xf32>,
    %c1 = arith.constant 1 : index
    %c0_9 = arith.constant 0 : index
    %c0_10 = arith.constant 0 : index
    %10 = vector.load %arg1[%c1, %c0_9, %c0_10] : memref<8x8x64xbf16, #tpu.memory_space<vmem>>, vector<1x8x64xbf16>
    %11 = vector.shape_cast %10 : vector<1x8x64xbf16> to vector<8x64xbf16>
    %cst_11 = arith.constant dense<0.000000e+00> : vector<8x256xf32>
    %12 = tpu.matmul %11, %0, %cst_11 {dimension_numbers = #tpu.dot_dimension_numbers<[1], [0], [0], [1], [0, 0, 1, 1], [], []>} : vector<8x64xbf16>, vector<64x256xbf16>, vector<8x256xf32> -> vector<8x256xf32>
    %13 = vector.broadcast %1 : vector<1x256xf32> to vector<8x256xf32>
    %14 = arith.addf %12, %13 : vector<8x256xf32>
    %c1_12 = arith.constant 1 : index
    %c0_13 = arith.constant 0 : index
    %c0_14 = arith.constant 0 : index
    %15 = vector.load %arg10[%c1_12, %c0_13, %c0_14] : memref<8x8x256xf32, #tpu.memory_space<vmem>>, vector<1x8x256xf32>
    %16 = vector.shape_cast %15 : vector<1x8x256xf32> to vector<8x256xf32>
    %17 = vector.shape_cast %14 : vector<8x256xf32> to vector<1x8x256xf32>
    tpu.vector_store %arg10[%c1_12, %c0_13, %c0_14], %17 {strides = array<i32>} : memref<8x8x256xf32, #tpu.memory_space<vmem>>, vector<1x8x256xf32>,
    %c2 = arith.constant 2 : index
    %c0_15 = arith.constant 0 : index
    %c0_16 = arith.constant 0 : index
    %18 = vector.load %arg1[%c2, %c0_15, %c0_16] : memref<8x8x64xbf16, #tpu.memory_space<vmem>>, vector<1x8x64xbf16>
    %19 = vector.shape_cast %18 : vector<1x8x64xbf16> to vector<8x64xbf16>
    %cst_17 = arith.constant dense<0.000000e+00> : vector<8x256xf32>
    %20 = tpu.matmul %19, %0, %cst_17 {dimension_numbers = #tpu.dot_dimension_numbers<[1], [0], [0], [1], [0, 0, 1, 1], [], []>} : vector<8x64xbf16>, vector<64x256xbf16>, vector<8x256xf32> -> vector<8x256xf32>
    %21 = vector.broadcast %1 : vector<1x256xf32> to vector<8x256xf32>
    %22 = arith.addf %20, %21 : vector<8x256xf32>
    %c2_18 = arith.constant 2 : index
    %c0_19 = arith.constant 0 : index
    %c0_20 = arith.constant 0 : index
    %23 = vector.load %arg10[%c2_18, %c0_19, %c0_20] : memref<8x8x256xf32, #tpu.memory_space<vmem>>, vector<1x8x256xf32>
    %24 = vector.shape_cast %23 : vector<1x8x256xf32> to vector<8x256xf32>
    %25 = vector.shape_cast %22 : vector<8x256xf32> to vector<1x8x256xf32>
    tpu.vector_store %arg10[%c2_18, %c0_19, %c0_20], %25 {strides = array<i32>} : memref<8x8x256xf32, #tpu.memory_space<vmem>>, vector<1x8x256xf32>,
    %c3 = arith.constant 3 : index
    %c0_21 = arith.constant 0 : index
    %c0_22 = arith.constant 0 : index
    %26 = vector.load %arg1[%c3, %c0_21, %c0_22] : memref<8x8x64xbf16, #tpu.memory_space<vmem>>, vector<1x8x64xbf16>
    %27 = vector.shape_cast %26 : vector<1x8x64xbf16> to vector<8x64xbf16>
    %cst_23 = arith.constant dense<0.000000e+00> : vector<8x256xf32>
    %28 = tpu.matmul %27, %0, %cst_23 {dimension_numbers = #tpu.dot_dimension_numbers<[1], [0], [0], [1], [0, 0, 1, 1], [], []>} : vector<8x64xbf16>, vector<64x256xbf16>, vector<8x256xf32> -> vector<8x256xf32>
    %29 = vector.broadcast %1 : vector<1x256xf32> to vector<8x256xf32>
    %30 = arith.addf %28, %29 : vector<8x256xf32>
    %c3_24 = arith.constant 3 : index
    %c0_25 = arith.constant 0 : index
    %c0_26 = arith.constant 0 : index
    %31 = vector.load %arg10[%c3_24, %c0_25, %c0_26] : memref<8x8x256xf32, #tpu.memory_space<vmem>>, vector<1x8x256xf32>
    %32 = vector.shape_cast %31 : vector<1x8x256xf32> to vector<8x256xf32>
    %33 = vector.shape_cast %30 : vector<8x256xf32> to vector<1x8x256xf32>
    tpu.vector_store %arg10[%c3_24, %c0_25, %c0_26], %33 {strides = array<i32>} : memref<8x8x256xf32, #tpu.memory_space<vmem>>, vector<1x8x256xf32>,
    %c4 = arith.constant 4 : index
    %c0_27 = arith.constant 0 : index
    %c0_28 = arith.constant 0 : index
    %34 = vector.load %arg1[%c4, %c0_27, %c0_28] : memref<8x8x64xbf16, #tpu.memory_space<vmem>>, vector<1x8x64xbf16>
    %35 = vector.shape_cast %34 : vector<1x8x64xbf16> to vector<8x64xbf16>
    %cst_29 = arith.constant dense<0.000000e+00> : vector<8x256xf32>
    %36 = tpu.matmul %35, %0, %cst_29 {dimension_numbers = #tpu.dot_dimension_numbers<[1], [0], [0], [1], [0, 0, 1, 1], [], []>} : vector<8x64xbf16>, vector<64x256xbf16>, vector<8x256xf32> -> vector<8x256xf32>
    %37 = vector.broadcast %1 : vector<1x256xf32> to vector<8x256xf32>
    %38 = arith.addf %36, %37 : vector<8x256xf32>
    %c4_30 = arith.constant 4 : index
    %c0_31 = arith.constant 0 : index
    %c0_32 = arith.constant 0 : index
    %39 = vector.load %arg10[%c4_30, %c0_31, %c0_32] : memref<8x8x256xf32, #tpu.memory_space<vmem>>, vector<1x8x256xf32>
    %40 = vector.shape_cast %39 : vector<1x8x256xf32> to vector<8x256xf32>
    %41 = vector.shape_cast %38 : vector<8x256xf32> to vector<1x8x256xf32>
    tpu.vector_store %arg10[%c4_30, %c0_31, %c0_32], %41 {strides = array<i32>} : memref<8x8x256xf32, #tpu.memory_space<vmem>>, vector<1x8x256xf32>,
    %c5 = arith.constant 5 : index
    %c0_33 = arith.constant 0 : index
    %c0_34 = arith.constant 0 : index
    %42 = vector.load %arg1[%c5, %c0_33, %c0_34] : memref<8x8x64xbf16, #tpu.memory_space<vmem>>, vector<1x8x64xbf16>
    %43 = vector.shape_cast %42 : vector<1x8x64xbf16> to vector<8x64xbf16>
    %cst_35 = arith.constant dense<0.000000e+00> : vector<8x256xf32>
    %44 = tpu.matmul %43, %0, %cst_35 {dimension_numbers = #tpu.dot_dimension_numbers<[1], [0], [0], [1], [0, 0, 1, 1], [], []>} : vector<8x64xbf16>, vector<64x256xbf16>, vector<8x256xf32> -> vector<8x256xf32>
    %45 = vector.broadcast %1 : vector<1x256xf32> to vector<8x256xf32>
    %46 = arith.addf %44, %45 : vector<8x256xf32>
    %c5_36 = arith.constant 5 : index
    %c0_37 = arith.constant 0 : index
    %c0_38 = arith.constant 0 : index
    %47 = vector.load %arg10[%c5_36, %c0_37, %c0_38] : memref<8x8x256xf32, #tpu.memory_space<vmem>>, vector<1x8x256xf32>
    %48 = vector.shape_cast %47 : vector<1x8x256xf32> to vector<8x256xf32>
    %49 = vector.shape_cast %46 : vector<8x256xf32> to vector<1x8x256xf32>
    tpu.vector_store %arg10[%c5_36, %c0_37, %c0_38], %49 {strides = array<i32>} : memref<8x8x256xf32, #tpu.memory_space<vmem>>, vector<1x8x256xf32>,
    %c6 = arith.constant 6 : index
    %c0_39 = arith.constant 0 : index
    %c0_40 = arith.constant 0 : index
    %50 = vector.load %arg1[%c6, %c0_39, %c0_40] : memref<8x8x64xbf16, #tpu.memory_space<vmem>>, vector<1x8x64xbf16>
    %51 = vector.shape_cast %50 : vector<1x8x64xbf16> to vector<8x64xbf16>
    %cst_41 = arith.constant dense<0.000000e+00> : vector<8x256xf32>
    %52 = tpu.matmul %51, %0, %cst_41 {dimension_numbers = #tpu.dot_dimension_numbers<[1], [0], [0], [1], [0, 0, 1, 1], [], []>} : vector<8x64xbf16>, vector<64x256xbf16>, vector<8x256xf32> -> vector<8x256xf32>
    %53 = vector.broadcast %1 : vector<1x256xf32> to vector<8x256xf32>
    %54 = arith.addf %52, %53 : vector<8x256xf32>
    %c6_42 = arith.constant 6 : index
    %c0_43 = arith.constant 0 : index
    %c0_44 = arith.constant 0 : index
    %55 = vector.load %arg10[%c6_42, %c0_43, %c0_44] : memref<8x8x256xf32, #tpu.memory_space<vmem>>, vector<1x8x256xf32>
    %56 = vector.shape_cast %55 : vector<1x8x256xf32> to vector<8x256xf32>
    %57 = vector.shape_cast %54 : vector<8x256xf32> to vector<1x8x256xf32>
    tpu.vector_store %arg10[%c6_42, %c0_43, %c0_44], %57 {strides = array<i32>} : memref<8x8x256xf32, #tpu.memory_space<vmem>>, vector<1x8x256xf32>,
    %c7 = arith.constant 7 : index
    %c0_45 = arith.constant 0 : index
    %c0_46 = arith.constant 0 : index
    %58 = vector.load %arg1[%c7, %c0_45, %c0_46] : memref<8x8x64xbf16, #tpu.memory_space<vmem>>, vector<1x8x64xbf16>
    %59 = vector.shape_cast %58 : vector<1x8x64xbf16> to vector<8x64xbf16>
    %cst_47 = arith.constant dense<0.000000e+00> : vector<8x256xf32>
    %60 = tpu.matmul %59, %0, %cst_47 {dimension_numbers = #tpu.dot_dimension_numbers<[1], [0], [0], [1], [0, 0, 1, 1], [], []>} : vector<8x64xbf16>, vector<64x256xbf16>, vector<8x256xf32> -> vector<8x256xf32>
    %61 = vector.broadcast %1 : vector<1x256xf32> to vector<8x256xf32>
    %62 = arith.addf %60, %61 : vector<8x256xf32>
    %c7_48 = arith.constant 7 : index
    %c0_49 = arith.constant 0 : index
    %c0_50 = arith.constant 0 : index
    %63 = vector.load %arg10[%c7_48, %c0_49, %c0_50] : memref<8x8x256xf32, #tpu.memory_space<vmem>>, vector<1x8x256xf32>
    %64 = vector.shape_cast %63 : vector<1x8x256xf32> to vector<8x256xf32>
    %65 = vector.shape_cast %62 : vector<8x256xf32> to vector<1x8x256xf32>
    tpu.vector_store %arg10[%c7_48, %c0_49, %c0_50], %65 {strides = array<i32>} : memref<8x8x256xf32, #tpu.memory_space<vmem>>, vector<1x8x256xf32>,
    %66 = tpu.iota {dimensions = array<i32: 1>} : vector<8x256xi32>
    %c128_i32 = arith.constant 128 : i32
    %67 = vector.broadcast %c128_i32 : i32 to vector<8x256xi32>
    %68 = arith.cmpi sge, %66, %67 : vector<8x256xi32>
    %c192_i32 = arith.constant 192 : i32
    %69 = vector.broadcast %c192_i32 : i32 to vector<8x256xi32>
    %70 = arith.cmpi slt, %66, %69 : vector<8x256xi32>
    %71 = arith.andi %68, %70 : vector<8x256xi1>
    %cst_51 = arith.constant 1.000000e+00 : f32
    %cst_52 = arith.constant 5.000000e-01 : f32
    %72 = vector.broadcast %cst_51 : f32 to vector<8x256xf32>
    %73 = vector.broadcast %cst_52 : f32 to vector<8x256xf32>
    %74 = arith.select %71, %72, %73 : vector<8x256xi1>, vector<8x256xf32>
    %cst_53 = arith.constant 0.000000e+00 : f32
    %cst_54 = arith.constant 5.000000e-01 : f32
    %75 = vector.broadcast %cst_53 : f32 to vector<8x256xf32>
    %76 = vector.broadcast %cst_54 : f32 to vector<8x256xf32>
    %77 = arith.select %71, %75, %76 : vector<8x256xi1>, vector<8x256xf32>
    %c0_55 = arith.constant 0 : index
    %c0_56 = arith.constant 0 : index
    %78 = vector.load %arg4[%c0_55, %c0_56] : memref<64x256xbf16, #tpu.memory_space<vmem>>, vector<64x256xbf16>
    %cst_57 = arith.constant 0.000000e+00 : f32
    %79 = vector.broadcast %cst_57 : f32 to vector<8x64xf32>
    %cst_58 = arith.constant 0.000000e+00 : f32
    %80 = vector.broadcast %cst_58 : f32 to vector<8x64xf32>
    %c0_59 = arith.constant 0 : index
    %c0_60 = arith.constant 0 : index
    %c0_61 = arith.constant 0 : index
    %81 = vector.load %arg10[%c0_59, %c0_60, %c0_61] : memref<8x8x256xf32, #tpu.memory_space<vmem>>, vector<1x8x256xf32>
    %82 = vector.shape_cast %81 : vector<1x8x256xf32> to vector<8x256xf32>
    %83 = arith.truncf %79 : vector<8x64xf32> to vector<8x64xbf16>
    %cst_62 = arith.constant dense<0.000000e+00> : vector<8x256xf32>
    %84 = tpu.matmul %83, %78, %cst_62 {dimension_numbers = #tpu.dot_dimension_numbers<[1], [0], [0], [1], [0, 0, 1, 1], [], []>} : vector<8x64xbf16>, vector<64x256xbf16>, vector<8x256xf32> -> vector<8x256xf32>
    %85 = arith.addf %82, %84 : vector<8x256xf32>
    %86 = arith.mulf %74, %85 : vector<8x256xf32>
    %87 = math.tanh %86 : vector<8x256xf32>
    %88 = arith.mulf %74, %87 : vector<8x256xf32>
    %89 = arith.addf %88, %77 : vector<8x256xf32>
    %90 = vector.extract_strided_slice %89 {offsets = [0, 0], sizes = [8, 64], strides = [1, 1]} : vector<8x256xf32> to vector<8x64xf32>
    %91 = vector.extract_strided_slice %89 {offsets = [0, 64], sizes = [8, 64], strides = [1, 1]} : vector<8x256xf32> to vector<8x64xf32>
    %92 = vector.extract_strided_slice %89 {offsets = [0, 128], sizes = [8, 64], strides = [1, 1]} : vector<8x256xf32> to vector<8x64xf32>
    %93 = vector.extract_strided_slice %89 {offsets = [0, 192], sizes = [8, 64], strides = [1, 1]} : vector<8x256xf32> to vector<8x64xf32>
    %94 = arith.mulf %91, %80 : vector<8x64xf32>
    %95 = arith.mulf %90, %92 : vector<8x64xf32>
    %96 = arith.addf %94, %95 : vector<8x64xf32>
    %97 = math.tanh %96 : vector<8x64xf32>
    %98 = arith.mulf %93, %97 : vector<8x64xf32>
    %c1_63 = arith.constant 1 : index
    %c0_64 = arith.constant 0 : index
    %c0_65 = arith.constant 0 : index
    %99 = vector.load %arg10[%c1_63, %c0_64, %c0_65] : memref<8x8x256xf32, #tpu.memory_space<vmem>>, vector<1x8x256xf32>
    %100 = vector.shape_cast %99 : vector<1x8x256xf32> to vector<8x256xf32>
    %101 = arith.truncf %98 : vector<8x64xf32> to vector<8x64xbf16>
    %cst_66 = arith.constant dense<0.000000e+00> : vector<8x256xf32>
    %102 = tpu.matmul %101, %78, %cst_66 {dimension_numbers = #tpu.dot_dimension_numbers<[1], [0], [0], [1], [0, 0, 1, 1], [], []>} : vector<8x64xbf16>, vector<64x256xbf16>, vector<8x256xf32> -> vector<8x256xf32>
    %103 = arith.addf %100, %102 : vector<8x256xf32>
    %104 = arith.mulf %74, %103 : vector<8x256xf32>
    %105 = math.tanh %104 : vector<8x256xf32>
    %106 = arith.mulf %74, %105 : vector<8x256xf32>
    %107 = arith.addf %106, %77 : vector<8x256xf32>
    %108 = vector.extract_strided_slice %107 {offsets = [0, 0], sizes = [8, 64], strides = [1, 1]} : vector<8x256xf32> to vector<8x64xf32>
    %109 = vector.extract_strided_slice %107 {offsets = [0, 64], sizes = [8, 64], strides = [1, 1]} : vector<8x256xf32> to vector<8x64xf32>
    %110 = vector.extract_strided_slice %107 {offsets = [0, 128], sizes = [8, 64], strides = [1, 1]} : vector<8x256xf32> to vector<8x64xf32>
    %111 = vector.extract_strided_slice %107 {offsets = [0, 192], sizes = [8, 64], strides = [1, 1]} : vector<8x256xf32> to vector<8x64xf32>
    %112 = arith.mulf %109, %96 : vector<8x64xf32>
    %113 = arith.mulf %108, %110 : vector<8x64xf32>
    %114 = arith.addf %112, %113 : vector<8x64xf32>
    %115 = math.tanh %114 : vector<8x64xf32>
    %116 = arith.mulf %111, %115 : vector<8x64xf32>
    %c2_67 = arith.constant 2 : index
    %c0_68 = arith.constant 0 : index
    %c0_69 = arith.constant 0 : index
    %117 = vector.load %arg10[%c2_67, %c0_68, %c0_69] : memref<8x8x256xf32, #tpu.memory_space<vmem>>, vector<1x8x256xf32>
    %118 = vector.shape_cast %117 : vector<1x8x256xf32> to vector<8x256xf32>
    %119 = arith.truncf %116 : vector<8x64xf32> to vector<8x64xbf16>
    %cst_70 = arith.constant dense<0.000000e+00> : vector<8x256xf32>
    %120 = tpu.matmul %119, %78, %cst_70 {dimension_numbers = #tpu.dot_dimension_numbers<[1], [0], [0], [1], [0, 0, 1, 1], [], []>} : vector<8x64xbf16>, vector<64x256xbf16>, vector<8x256xf32> -> vector<8x256xf32>
    %121 = arith.addf %118, %120 : vector<8x256xf32>
    %122 = arith.mulf %74, %121 : vector<8x256xf32>
    %123 = math.tanh %122 : vector<8x256xf32>
    %124 = arith.mulf %74, %123 : vector<8x256xf32>
    %125 = arith.addf %124, %77 : vector<8x256xf32>
    %126 = vector.extract_strided_slice %125 {offsets = [0, 0], sizes = [8, 64], strides = [1, 1]} : vector<8x256xf32> to vector<8x64xf32>
    %127 = vector.extract_strided_slice %125 {offsets = [0, 64], sizes = [8, 64], strides = [1, 1]} : vector<8x256xf32> to vector<8x64xf32>
    %128 = vector.extract_strided_slice %125 {offsets = [0, 128], sizes = [8, 64], strides = [1, 1]} : vector<8x256xf32> to vector<8x64xf32>
    %129 = vector.extract_strided_slice %125 {offsets = [0, 192], sizes = [8, 64], strides = [1, 1]} : vector<8x256xf32> to vector<8x64xf32>
    %130 = arith.mulf %127, %114 : vector<8x64xf32>
    %131 = arith.mulf %126, %128 : vector<8x64xf32>
    %132 = arith.addf %130, %131 : vector<8x64xf32>
    %133 = math.tanh %132 : vector<8x64xf32>
    %134 = arith.mulf %129, %133 : vector<8x64xf32>
    %c3_71 = arith.constant 3 : index
    %c0_72 = arith.constant 0 : index
    %c0_73 = arith.constant 0 : index
    %135 = vector.load %arg10[%c3_71, %c0_72, %c0_73] : memref<8x8x256xf32, #tpu.memory_space<vmem>>, vector<1x8x256xf32>
    %136 = vector.shape_cast %135 : vector<1x8x256xf32> to vector<8x256xf32>
    %137 = arith.truncf %134 : vector<8x64xf32> to vector<8x64xbf16>
    %cst_74 = arith.constant dense<0.000000e+00> : vector<8x256xf32>
    %138 = tpu.matmul %137, %78, %cst_74 {dimension_numbers = #tpu.dot_dimension_numbers<[1], [0], [0], [1], [0, 0, 1, 1], [], []>} : vector<8x64xbf16>, vector<64x256xbf16>, vector<8x256xf32> -> vector<8x256xf32>
    %139 = arith.addf %136, %138 : vector<8x256xf32>
    %140 = arith.mulf %74, %139 : vector<8x256xf32>
    %141 = math.tanh %140 : vector<8x256xf32>
    %142 = arith.mulf %74, %141 : vector<8x256xf32>
    %143 = arith.addf %142, %77 : vector<8x256xf32>
    %144 = vector.extract_strided_slice %143 {offsets = [0, 0], sizes = [8, 64], strides = [1, 1]} : vector<8x256xf32> to vector<8x64xf32>
    %145 = vector.extract_strided_slice %143 {offsets = [0, 64], sizes = [8, 64], strides = [1, 1]} : vector<8x256xf32> to vector<8x64xf32>
    %146 = vector.extract_strided_slice %143 {offsets = [0, 128], sizes = [8, 64], strides = [1, 1]} : vector<8x256xf32> to vector<8x64xf32>
    %147 = vector.extract_strided_slice %143 {offsets = [0, 192], sizes = [8, 64], strides = [1, 1]} : vector<8x256xf32> to vector<8x64xf32>
    %148 = arith.mulf %145, %132 : vector<8x64xf32>
    %149 = arith.mulf %144, %146 : vector<8x64xf32>
    %150 = arith.addf %148, %149 : vector<8x64xf32>
    %151 = math.tanh %150 : vector<8x64xf32>
    %152 = arith.mulf %147, %151 : vector<8x64xf32>
    %c4_75 = arith.constant 4 : index
    %c0_76 = arith.constant 0 : index
    %c0_77 = arith.constant 0 : index
    %153 = vector.load %arg10[%c4_75, %c0_76, %c0_77] : memref<8x8x256xf32, #tpu.memory_space<vmem>>, vector<1x8x256xf32>
    %154 = vector.shape_cast %153 : vector<1x8x256xf32> to vector<8x256xf32>
    %155 = arith.truncf %152 : vector<8x64xf32> to vector<8x64xbf16>
    %cst_78 = arith.constant dense<0.000000e+00> : vector<8x256xf32>
    %156 = tpu.matmul %155, %78, %cst_78 {dimension_numbers = #tpu.dot_dimension_numbers<[1], [0], [0], [1], [0, 0, 1, 1], [], []>} : vector<8x64xbf16>, vector<64x256xbf16>, vector<8x256xf32> -> vector<8x256xf32>
    %157 = arith.addf %154, %156 : vector<8x256xf32>
    %158 = arith.mulf %74, %157 : vector<8x256xf32>
    %159 = math.tanh %158 : vector<8x256xf32>
    %160 = arith.mulf %74, %159 : vector<8x256xf32>
    %161 = arith.addf %160, %77 : vector<8x256xf32>
    %162 = vector.extract_strided_slice %161 {offsets = [0, 0], sizes = [8, 64], strides = [1, 1]} : vector<8x256xf32> to vector<8x64xf32>
    %163 = vector.extract_strided_slice %161 {offsets = [0, 64], sizes = [8, 64], strides = [1, 1]} : vector<8x256xf32> to vector<8x64xf32>
    %164 = vector.extract_strided_slice %161 {offsets = [0, 128], sizes = [8, 64], strides = [1, 1]} : vector<8x256xf32> to vector<8x64xf32>
    %165 = vector.extract_strided_slice %161 {offsets = [0, 192], sizes = [8, 64], strides = [1, 1]} : vector<8x256xf32> to vector<8x64xf32>
    %166 = arith.mulf %163, %150 : vector<8x64xf32>
    %167 = arith.mulf %162, %164 : vector<8x64xf32>
    %168 = arith.addf %166, %167 : vector<8x64xf32>
    %169 = math.tanh %168 : vector<8x64xf32>
    %170 = arith.mulf %165, %169 : vector<8x64xf32>
    %c5_79 = arith.constant 5 : index
    %c0_80 = arith.constant 0 : index
    %c0_81 = arith.constant 0 : index
    %171 = vector.load %arg10[%c5_79, %c0_80, %c0_81] : memref<8x8x256xf32, #tpu.memory_space<vmem>>, vector<1x8x256xf32>
    %172 = vector.shape_cast %171 : vector<1x8x256xf32> to vector<8x256xf32>
    %173 = arith.truncf %170 : vector<8x64xf32> to vector<8x64xbf16>
    %cst_82 = arith.constant dense<0.000000e+00> : vector<8x256xf32>
    %174 = tpu.matmul %173, %78, %cst_82 {dimension_numbers = #tpu.dot_dimension_numbers<[1], [0], [0], [1], [0, 0, 1, 1], [], []>} : vector<8x64xbf16>, vector<64x256xbf16>, vector<8x256xf32> -> vector<8x256xf32>
    %175 = arith.addf %172, %174 : vector<8x256xf32>
    %176 = arith.mulf %74, %175 : vector<8x256xf32>
    %177 = math.tanh %176 : vector<8x256xf32>
    %178 = arith.mulf %74, %177 : vector<8x256xf32>
    %179 = arith.addf %178, %77 : vector<8x256xf32>
    %180 = vector.extract_strided_slice %179 {offsets = [0, 0], sizes = [8, 64], strides = [1, 1]} : vector<8x256xf32> to vector<8x64xf32>
    %181 = vector.extract_strided_slice %179 {offsets = [0, 64], sizes = [8, 64], strides = [1, 1]} : vector<8x256xf32> to vector<8x64xf32>
    %182 = vector.extract_strided_slice %179 {offsets = [0, 128], sizes = [8, 64], strides = [1, 1]} : vector<8x256xf32> to vector<8x64xf32>
    %183 = vector.extract_strided_slice %179 {offsets = [0, 192], sizes = [8, 64], strides = [1, 1]} : vector<8x256xf32> to vector<8x64xf32>
    %184 = arith.mulf %181, %168 : vector<8x64xf32>
    %185 = arith.mulf %180, %182 : vector<8x64xf32>
    %186 = arith.addf %184, %185 : vector<8x64xf32>
    %187 = math.tanh %186 : vector<8x64xf32>
    %188 = arith.mulf %183, %187 : vector<8x64xf32>
    %c6_83 = arith.constant 6 : index
    %c0_84 = arith.constant 0 : index
    %c0_85 = arith.constant 0 : index
    %189 = vector.load %arg10[%c6_83, %c0_84, %c0_85] : memref<8x8x256xf32, #tpu.memory_space<vmem>>, vector<1x8x256xf32>
    %190 = vector.shape_cast %189 : vector<1x8x256xf32> to vector<8x256xf32>
    %191 = arith.truncf %188 : vector<8x64xf32> to vector<8x64xbf16>
    %cst_86 = arith.constant dense<0.000000e+00> : vector<8x256xf32>
    %192 = tpu.matmul %191, %78, %cst_86 {dimension_numbers = #tpu.dot_dimension_numbers<[1], [0], [0], [1], [0, 0, 1, 1], [], []>} : vector<8x64xbf16>, vector<64x256xbf16>, vector<8x256xf32> -> vector<8x256xf32>
    %193 = arith.addf %190, %192 : vector<8x256xf32>
    %194 = arith.mulf %74, %193 : vector<8x256xf32>
    %195 = math.tanh %194 : vector<8x256xf32>
    %196 = arith.mulf %74, %195 : vector<8x256xf32>
    %197 = arith.addf %196, %77 : vector<8x256xf32>
    %198 = vector.extract_strided_slice %197 {offsets = [0, 0], sizes = [8, 64], strides = [1, 1]} : vector<8x256xf32> to vector<8x64xf32>
    %199 = vector.extract_strided_slice %197 {offsets = [0, 64], sizes = [8, 64], strides = [1, 1]} : vector<8x256xf32> to vector<8x64xf32>
    %200 = vector.extract_strided_slice %197 {offsets = [0, 128], sizes = [8, 64], strides = [1, 1]} : vector<8x256xf32> to vector<8x64xf32>
    %201 = vector.extract_strided_slice %197 {offsets = [0, 192], sizes = [8, 64], strides = [1, 1]} : vector<8x256xf32> to vector<8x64xf32>
    %202 = arith.mulf %199, %186 : vector<8x64xf32>
    %203 = arith.mulf %198, %200 : vector<8x64xf32>
    %204 = arith.addf %202, %203 : vector<8x64xf32>
    %205 = math.tanh %204 : vector<8x64xf32>
    %206 = arith.mulf %201, %205 : vector<8x64xf32>
    %c7_87 = arith.constant 7 : index
    %c0_88 = arith.constant 0 : index
    %c0_89 = arith.constant 0 : index
    %207 = vector.load %arg10[%c7_87, %c0_88, %c0_89] : memref<8x8x256xf32, #tpu.memory_space<vmem>>, vector<1x8x256xf32>
    %208 = vector.shape_cast %207 : vector<1x8x256xf32> to vector<8x256xf32>
    %209 = arith.truncf %206 : vector<8x64xf32> to vector<8x64xbf16>
    %cst_90 = arith.constant dense<0.000000e+00> : vector<8x256xf32>
    %210 = tpu.matmul %209, %78, %cst_90 {dimension_numbers = #tpu.dot_dimension_numbers<[1], [0], [0], [1], [0, 0, 1, 1], [], []>} : vector<8x64xbf16>, vector<64x256xbf16>, vector<8x256xf32> -> vector<8x256xf32>
    %211 = arith.addf %208, %210 : vector<8x256xf32>
    %212 = arith.mulf %74, %211 : vector<8x256xf32>
    %213 = math.tanh %212 : vector<8x256xf32>
    %214 = arith.mulf %74, %213 : vector<8x256xf32>
    %215 = arith.addf %214, %77 : vector<8x256xf32>
    %216 = vector.extract_strided_slice %215 {offsets = [0, 0], sizes = [8, 64], strides = [1, 1]} : vector<8x256xf32> to vector<8x64xf32>
    %217 = vector.extract_strided_slice %215 {offsets = [0, 64], sizes = [8, 64], strides = [1, 1]} : vector<8x256xf32> to vector<8x64xf32>
    %218 = vector.extract_strided_slice %215 {offsets = [0, 128], sizes = [8, 64], strides = [1, 1]} : vector<8x256xf32> to vector<8x64xf32>
    %219 = vector.extract_strided_slice %215 {offsets = [0, 192], sizes = [8, 64], strides = [1, 1]} : vector<8x256xf32> to vector<8x64xf32>
    %220 = arith.mulf %217, %204 : vector<8x64xf32>
    %221 = arith.mulf %216, %218 : vector<8x64xf32>
    %222 = arith.addf %220, %221 : vector<8x64xf32>
    %223 = math.tanh %222 : vector<8x64xf32>
    %224 = arith.mulf %219, %223 : vector<8x64xf32>
    %225 = tpu.iota {dimensions = array<i32: 1>} : vector<8x64xi32>
    %c32_i32 = arith.constant 32 : i32
    %226 = vector.broadcast %c32_i32 : i32 to vector<8x64xi32>
    %227 = arith.cmpi slt, %225, %226 : vector<8x64xi32>
    %228 = arith.select %227, %98, %224 : vector<8x64xi1>, vector<8x64xf32>
    %229 = arith.select %227, %116, %206 : vector<8x64xi1>, vector<8x64xf32>
    %230 = arith.select %227, %134, %188 : vector<8x64xi1>, vector<8x64xf32>
    %231 = arith.select %227, %152, %170 : vector<8x64xi1>, vector<8x64xf32>
    %232 = arith.select %227, %170, %152 : vector<8x64xi1>, vector<8x64xf32>
    %233 = arith.select %227, %188, %134 : vector<8x64xi1>, vector<8x64xf32>
    %234 = arith.select %227, %206, %116 : vector<8x64xi1>, vector<8x64xf32>
    %235 = arith.select %227, %224, %98 : vector<8x64xi1>, vector<8x64xf32>
    %236 = tpu.concatenate %228, %229, %230, %231, %232, %233, %234, %235 in 0 : vector<8x64xf32>, vector<8x64xf32>, vector<8x64xf32>, vector<8x64xf32>, vector<8x64xf32>, vector<8x64xf32>, vector<8x64xf32>, vector<8x64xf32> -> vector<64x64xf32>
    %237 = arith.truncf %236 : vector<64x64xf32> to vector<64x64xbf16>
    %c0_91 = arith.constant 0 : index
    %c0_92 = arith.constant 0 : index
    %238 = vector.load %arg5[%c0_91, %c0_92] : memref<64x64xbf16, #tpu.memory_space<vmem>>, vector<64x64xbf16>
    %cst_93 = arith.constant dense<0.000000e+00> : vector<64x64xf32>
    %239 = tpu.matmul %237, %238, %cst_93 {dimension_numbers = #tpu.dot_dimension_numbers<[1], [0], [0], [1], [0, 0, 1, 1], [], []>} : vector<64x64xbf16>, vector<64x64xbf16>, vector<64x64xf32> -> vector<64x64xf32>
    %c0_94 = arith.constant 0 : index
    %c0_95 = arith.constant 0 : index
    %240 = vector.load %arg6[%c0_94, %c0_95] : memref<1x64xf32, #tpu.memory_space<vmem>>, vector<1x64xf32>
    %241 = vector.broadcast %240 : vector<1x64xf32> to vector<64x64xf32>
    %242 = arith.addf %239, %241 : vector<64x64xf32>
    %cst_96 = arith.constant 0.000000e+00 : f32
    %243 = vector.broadcast %cst_96 : f32 to vector<64x64xf32>
    %244 = arith.maximumf %242, %243 : vector<64x64xf32>
    %245 = arith.truncf %244 : vector<64x64xf32> to vector<64x64xbf16>
    %c0_97 = arith.constant 0 : index
    %c0_98 = arith.constant 0 : index
    %246 = vector.load %arg7[%c0_97, %c0_98] : memref<64x128xbf16, #tpu.memory_space<vmem>>, vector<64x128xbf16>
    %cst_99 = arith.constant dense<0.000000e+00> : vector<64x128xf32>
    %247 = tpu.matmul %245, %246, %cst_99 {dimension_numbers = #tpu.dot_dimension_numbers<[1], [0], [0], [1], [0, 0, 1, 1], [], []>} : vector<64x64xbf16>, vector<64x128xbf16>, vector<64x128xf32> -> vector<64x128xf32>
    %c0_100 = arith.constant 0 : index
    %c0_101 = arith.constant 0 : index
    %248 = vector.load %arg8[%c0_100, %c0_101] : memref<1x128xf32, #tpu.memory_space<vmem>>, vector<1x128xf32>
    %249 = vector.broadcast %248 : vector<1x128xf32> to vector<64x128xf32>
    %250 = arith.addf %247, %249 : vector<64x128xf32>
    %251 = vector.extract_strided_slice %250 {offsets = [0, 0], sizes = [8, 128], strides = [1, 1]} : vector<64x128xf32> to vector<8x128xf32>
    %c0_102 = arith.constant 0 : index
    %c0_103 = arith.constant 0 : index
    %c0_104 = arith.constant 0 : index
    %252 = vector.load %arg9[%c0_102, %c0_103, %c0_104] : memref<8x8x128xf32, #tpu.memory_space<vmem>>, vector<1x8x128xf32>
    %253 = vector.shape_cast %252 : vector<1x8x128xf32> to vector<8x128xf32>
    %254 = vector.shape_cast %251 : vector<8x128xf32> to vector<1x8x128xf32>
    tpu.vector_store %arg9[%c0_102, %c0_103, %c0_104], %254 {strides = array<i32>} : memref<8x8x128xf32, #tpu.memory_space<vmem>>, vector<1x8x128xf32>,
    %255 = vector.extract_strided_slice %250 {offsets = [8, 0], sizes = [8, 128], strides = [1, 1]} : vector<64x128xf32> to vector<8x128xf32>
    %c1_105 = arith.constant 1 : index
    %c0_106 = arith.constant 0 : index
    %c0_107 = arith.constant 0 : index
    %256 = vector.load %arg9[%c1_105, %c0_106, %c0_107] : memref<8x8x128xf32, #tpu.memory_space<vmem>>, vector<1x8x128xf32>
    %257 = vector.shape_cast %256 : vector<1x8x128xf32> to vector<8x128xf32>
    %258 = vector.shape_cast %255 : vector<8x128xf32> to vector<1x8x128xf32>
    tpu.vector_store %arg9[%c1_105, %c0_106, %c0_107], %258 {strides = array<i32>} : memref<8x8x128xf32, #tpu.memory_space<vmem>>, vector<1x8x128xf32>,
    %259 = vector.extract_strided_slice %250 {offsets = [16, 0], sizes = [8, 128], strides = [1, 1]} : vector<64x128xf32> to vector<8x128xf32>
    %c2_108 = arith.constant 2 : index
    %c0_109 = arith.constant 0 : index
    %c0_110 = arith.constant 0 : index
    %260 = vector.load %arg9[%c2_108, %c0_109, %c0_110] : memref<8x8x128xf32, #tpu.memory_space<vmem>>, vector<1x8x128xf32>
    %261 = vector.shape_cast %260 : vector<1x8x128xf32> to vector<8x128xf32>
    %262 = vector.shape_cast %259 : vector<8x128xf32> to vector<1x8x128xf32>
    tpu.vector_store %arg9[%c2_108, %c0_109, %c0_110], %262 {strides = array<i32>} : memref<8x8x128xf32, #tpu.memory_space<vmem>>, vector<1x8x128xf32>,
    %263 = vector.extract_strided_slice %250 {offsets = [24, 0], sizes = [8, 128], strides = [1, 1]} : vector<64x128xf32> to vector<8x128xf32>
    %c3_111 = arith.constant 3 : index
    %c0_112 = arith.constant 0 : index
    %c0_113 = arith.constant 0 : index
    %264 = vector.load %arg9[%c3_111, %c0_112, %c0_113] : memref<8x8x128xf32, #tpu.memory_space<vmem>>, vector<1x8x128xf32>
    %265 = vector.shape_cast %264 : vector<1x8x128xf32> to vector<8x128xf32>
    %266 = vector.shape_cast %263 : vector<8x128xf32> to vector<1x8x128xf32>
    tpu.vector_store %arg9[%c3_111, %c0_112, %c0_113], %266 {strides = array<i32>} : memref<8x8x128xf32, #tpu.memory_space<vmem>>, vector<1x8x128xf32>,
    %267 = vector.extract_strided_slice %250 {offsets = [32, 0], sizes = [8, 128], strides = [1, 1]} : vector<64x128xf32> to vector<8x128xf32>
    %c4_114 = arith.constant 4 : index
    %c0_115 = arith.constant 0 : index
    %c0_116 = arith.constant 0 : index
    %268 = vector.load %arg9[%c4_114, %c0_115, %c0_116] : memref<8x8x128xf32, #tpu.memory_space<vmem>>, vector<1x8x128xf32>
    %269 = vector.shape_cast %268 : vector<1x8x128xf32> to vector<8x128xf32>
    %270 = vector.shape_cast %267 : vector<8x128xf32> to vector<1x8x128xf32>
    tpu.vector_store %arg9[%c4_114, %c0_115, %c0_116], %270 {strides = array<i32>} : memref<8x8x128xf32, #tpu.memory_space<vmem>>, vector<1x8x128xf32>,
    %271 = vector.extract_strided_slice %250 {offsets = [40, 0], sizes = [8, 128], strides = [1, 1]} : vector<64x128xf32> to vector<8x128xf32>
    %c5_117 = arith.constant 5 : index
    %c0_118 = arith.constant 0 : index
    %c0_119 = arith.constant 0 : index
    %272 = vector.load %arg9[%c5_117, %c0_118, %c0_119] : memref<8x8x128xf32, #tpu.memory_space<vmem>>, vector<1x8x128xf32>
    %273 = vector.shape_cast %272 : vector<1x8x128xf32> to vector<8x128xf32>
    %274 = vector.shape_cast %271 : vector<8x128xf32> to vector<1x8x128xf32>
    tpu.vector_store %arg9[%c5_117, %c0_118, %c0_119], %274 {strides = array<i32>} : memref<8x8x128xf32, #tpu.memory_space<vmem>>, vector<1x8x128xf32>,
    %275 = vector.extract_strided_slice %250 {offsets = [48, 0], sizes = [8, 128], strides = [1, 1]} : vector<64x128xf32> to vector<8x128xf32>
    %c6_120 = arith.constant 6 : index
    %c0_121 = arith.constant 0 : index
    %c0_122 = arith.constant 0 : index
    %276 = vector.load %arg9[%c6_120, %c0_121, %c0_122] : memref<8x8x128xf32, #tpu.memory_space<vmem>>, vector<1x8x128xf32>
    %277 = vector.shape_cast %276 : vector<1x8x128xf32> to vector<8x128xf32>
    %278 = vector.shape_cast %275 : vector<8x128xf32> to vector<1x8x128xf32>
    tpu.vector_store %arg9[%c6_120, %c0_121, %c0_122], %278 {strides = array<i32>} : memref<8x8x128xf32, #tpu.memory_space<vmem>>, vector<1x8x128xf32>,
    %279 = vector.extract_strided_slice %250 {offsets = [56, 0], sizes = [8, 128], strides = [1, 1]} : vector<64x128xf32> to vector<8x128xf32>
    %c7_123 = arith.constant 7 : index
    %c0_124 = arith.constant 0 : index
    %c0_125 = arith.constant 0 : index
    %280 = vector.load %arg9[%c7_123, %c0_124, %c0_125] : memref<8x8x128xf32, #tpu.memory_space<vmem>>, vector<1x8x128xf32>
    %281 = vector.shape_cast %280 : vector<1x8x128xf32> to vector<8x128xf32>
    %282 = vector.shape_cast %279 : vector<8x128xf32> to vector<1x8x128xf32>
    tpu.vector_store %arg9[%c7_123, %c0_124, %c0_125], %282 {strides = array<i32>} : memref<8x8x128xf32, #tpu.memory_space<vmem>>, vector<1x8x128xf32>,
    return
  }
  func.func @transform_0(%arg0: i32) -> (i32, i32, i32) {
    %c0_i32 = arith.constant 0 : i32
    %c0_i32_0 = arith.constant 0 : i32
    %c0_i32_1 = arith.constant 0 : i32
    return %c0_i32, %arg0, %c0_i32_0 : i32, i32, i32
  }
  func.func @transform_1(%arg0: i32) -> (i32, i32) {
    %c0_i32 = arith.constant 0 : i32
    %c0_i32_0 = arith.constant 0 : i32
    %c0_i32_1 = arith.constant 0 : i32
    return %c0_i32, %c0_i32_0 : i32, i32
  }
  func.func @transform_2(%arg0: i32) -> (i32, i32) {
    %c0_i32 = arith.constant 0 : i32
    %c0_i32_0 = arith.constant 0 : i32
    %c0_i32_1 = arith.constant 0 : i32
    return %c0_i32, %c0_i32_0 : i32, i32
  }
  func.func @transform_3(%arg0: i32) -> (i32, i32) {
    %c0_i32 = arith.constant 0 : i32
    %c0_i32_0 = arith.constant 0 : i32
    %c0_i32_1 = arith.constant 0 : i32
    return %c0_i32, %c0_i32_0 : i32, i32
  }
  func.func @transform_4(%arg0: i32) -> (i32, i32) {
    %c0_i32 = arith.constant 0 : i32
    %c0_i32_0 = arith.constant 0 : i32
    %c0_i32_1 = arith.constant 0 : i32
    return %c0_i32, %c0_i32_0 : i32, i32
  }
  func.func @transform_5(%arg0: i32) -> (i32, i32) {
    %c0_i32 = arith.constant 0 : i32
    %c0_i32_0 = arith.constant 0 : i32
    %c0_i32_1 = arith.constant 0 : i32
    return %c0_i32, %c0_i32_0 : i32, i32
  }
  func.func @transform_6(%arg0: i32) -> (i32, i32) {
    %c0_i32 = arith.constant 0 : i32
    %c0_i32_0 = arith.constant 0 : i32
    %c0_i32_1 = arith.constant 0 : i32
    return %c0_i32, %c0_i32_0 : i32, i32
  }
  func.func @transform_7(%arg0: i32) -> (i32, i32) {
    %c0_i32 = arith.constant 0 : i32
    %c0_i32_0 = arith.constant 0 : i32
    %c0_i32_1 = arith.constant 0 : i32
    return %c0_i32, %c0_i32_0 : i32, i32
  }
  func.func @transform_8(%arg0: i32) -> (i32, i32, i32) {
    %c0_i32 = arith.constant 0 : i32
    %c0_i32_0 = arith.constant 0 : i32
    %c0_i32_1 = arith.constant 0 : i32
    return %c0_i32, %arg0, %c0_i32_0 : i32, i32, i32
  }
}

</mosaic_0001>

<bundles_post_ra>
// kernel: tpu_custom_call.1
= control target key start
LH: loop header
LB: loop body
LE: loop exit
PB: predicated region body
PF: predicated region fallthrough
CT: control target
= control target key end

     0   :  { %13 = vsyncpa [#allocation4], 0  ;;  %s2352_s0 = inlined_call_operand.hbm [shape: bf16[8,8,64], index: 0, kind: input, shape index: {}]   ;;  %s2353_s1 = inlined_call_operand.hbm [shape: bf16[64,256], index: 1, kind: input, shape index: {}]   ;;  %s2354_s2 = inlined_call_operand.vmem [shape: f32[1,256], index: 2, kind: input, shape index: {}]   ;;  %s2355_s3 = inlined_call_operand.hbm [shape: bf16[64,256], index: 3, kind: input, shape index: {}]   ;;  %s2356_s4 = inlined_call_operand.hbm [shape: bf16[64,64], index: 4, kind: input, shape index: {}]   ;;  %s2357_s5 = inlined_call_operand.vmem [shape: f32[1,64], index: 5, kind: input, shape index: {}]   ;;  %s2358_s6 = inlined_call_operand.hbm [shape: bf16[64,128], index: 6, kind: input, shape index: {}]   ;;  %s2359_s7 = inlined_call_operand.vmem [shape: f32[1,128], index: 7, kind: input, shape index: {}]   ;;  %s2360_s8 = inlined_call_operand.hbm [shape: f32[8,8,128], index: 8, kind: output, shape index: {}]  }
   0x1   :  { %14 = vsyncpa [#allocation7], 0 }
   0x2   :  { %15 = vsyncpa [#allocation10], 0 }
   0x3   :  { %16 = vsyncpa [#allocation5], 0  ;;  %s1879_s27 = smov [#allocation6]   ;;  %s1739_s9 = scalar_lea.hbm %s2353_s1, 1024 }
   0x4   :  { %s34_s28 = sshll.u32 %s1879_s27, 4  ;;  %p1740_p0 = scmp.ne.s32.totalorder %s2353_s1, %s1739_s9  ;;  %s35_s28 = int_to_ptr.vmem [resolvable:$true] %s34_s28 }
   0x5   :  { %p1743_p1 = scmp.lt.u32.totalorder %s1739_s9, %s2353_s1 }
   0x7   :  { %p1745_p2 = pnand %p1743_p1, %p1740_p0 }
   0x9   :  { %1748 = shalt.err (!%p1745_p2)
}
   0xa   :  { %s1749_s14 = scalar_lea.vmem %s35_s28, 1024  ;;  %p1754_p4 = scmp.lt.s32.totalorder %s35_s28, %s35_s28 }
   0xb   :  { %p1750_p3 = scmp.ne.s32.totalorder %s35_s28, %s1749_s14  ;;  %p1755_p5 = scmp.lt.s32.totalorder %s1749_s14, %s1749_s14 }
   0xd   :  { %p1756_p6 = por %p1755_p5, %p1754_p4 }
   0xf   :  { %p1757_p7 = pnand %p1756_p6, %p1750_p3 }
  0x11   :  { %1760 = shalt.err (!%p1757_p7)
}
  0x12   :  { %s1880_s15 = smov 128   ;;  %s1881_s16 = smov 8  }
  0x13   :  { %40 = dma.hbm_to_vmem [thread:$0]  %s2353_s1, 1024, %s35_s28, [#allocation7], %s1880_s15, %s1880_s15, %s1881_s16  }
  0x14   :  { %s1882_s19 = smov [#allocation9]   ;;  %s1883_s21 = smov [#allocation3]  }
  0x15   :  { %s60_s20 = sshll.u32 %s1882_s19, 4  ;;  %s22_s22 = sshll.u32 %s1883_s21, 4  ;;  %s61_s20 = int_to_ptr.vmem [resolvable:$true] %s60_s20  ;;  %s23_s22 = int_to_ptr.vmem [resolvable:$true] %s22_s22 }
  0x16   :  { %s1761_s25 = scalar_lea.hbm %s2356_s4, 512 }
  0x17   :  { %p1762_p8 = scmp.ne.s32.totalorder %s2356_s4, %s1761_s25  ;;  %p1765_p9 = scmp.lt.u32.totalorder %s1761_s25, %s2356_s4 }
  0x19   :  { %p1767_p10 = pnand %p1765_p9, %p1762_p8 }
  0x1b   :  { %1770 = shalt.err (!%p1767_p10)
}
  0x1c   :  { %s1771_s1 = scalar_lea.vmem %s61_s20, 512  ;;  %p1776_p12 = scmp.lt.s32.totalorder %s61_s20, %s61_s20 }
  0x1d   :  { %p1772_p11 = scmp.ne.s32.totalorder %s61_s20, %s1771_s1  ;;  %p1777_p13 = scmp.lt.s32.totalorder %s1771_s1, %s1771_s1 }
  0x1f   :  { %p1778_p0 = por %p1777_p13, %p1776_p12 }
  0x21   :  { %p1779_p1 = pnand %p1778_p0, %p1772_p11 }
  0x23   :  { %1782 = shalt.err (!%p1779_p1)
}
  0x24   :  { %s1884_s28 = smov 64   ;;  %s1885_s9 = smov 4  }
  0x25   :  { %66 = dma.hbm_to_vmem [thread:$0]  %s2356_s4, 512, %s61_s20, [#allocation10], %s1884_s28, %s1884_s28, %s1885_s9  }
  0x26   :  { %s1783_s14 = scalar_lea.hbm %s2352_s0, 512 }
  0x27   :  { %p1784_p2 = scmp.ne.s32.totalorder %s2352_s0, %s1783_s14  ;;  %p1787_p3 = scmp.lt.u32.totalorder %s1783_s14, %s2352_s0 }
  0x29   :  { %p1789_p4 = pnand %p1787_p3, %p1784_p2 }
  0x2b   :  { %1792 = shalt.err (!%p1789_p4)
}
  0x2c   :  { %s1793_s23 = scalar_lea.vmem %s23_s22, 512  ;;  %p1798_p6 = scmp.lt.s32.totalorder %s23_s22, %s23_s22 }
  0x2d   :  { %p1794_p5 = scmp.ne.s32.totalorder %s23_s22, %s1793_s23  ;;  %p1799_p7 = scmp.lt.s32.totalorder %s1793_s23, %s1793_s23 }
  0x2f   :  { %p1800_p8 = por %p1799_p7, %p1798_p6 }
  0x31   :  { %p1801_p9 = pnand %p1800_p8, %p1794_p5 }
  0x33   :  { %1804 = shalt.err (!%p1801_p9)
}
  0x34   :  { %28 = dma.hbm_to_vmem [thread:$0]  %s2352_s0, 512, %s23_s22, [#allocation4], %s1884_s28, %s1884_s28, %s1885_s9  }
  0x35   :  { %s1886_s24 = smov [#allocation8]   ;;  %s1887_s26 = smov [#allocation11]  }
  0x36   :  { %s48_s25 = sshll.u32 %s1886_s24, 4  ;;  %s74_s27 = sshll.u32 %s1887_s26, 4  ;;  %s49_s25 = int_to_ptr.vmem [resolvable:$true] %s48_s25  ;;  %s75_s27 = int_to_ptr.vmem [resolvable:$true] %s74_s27 }
  0x37   :  { %s1805_s1 = scalar_lea.hbm %s2355_s3, 1024 }
  0x38   :  { %p1806_p10 = scmp.ne.s32.totalorder %s2355_s3, %s1805_s1  ;;  %p1809_p11 = scmp.lt.u32.totalorder %s1805_s1, %s2355_s3 }
  0x3a   :  { %p1811_p12 = pnand %p1809_p11, %p1806_p10 }
  0x3c   :  { %1814 = shalt.err (!%p1811_p12)
}
  0x3d   :  { %s1815_s0 = scalar_lea.vmem %s49_s25, 1024  ;;  %p1820_p0 = scmp.lt.s32.totalorder %s49_s25, %s49_s25 }
  0x3e   :  { %p1816_p13 = scmp.ne.s32.totalorder %s49_s25, %s1815_s0  ;;  %p1821_p1 = scmp.lt.s32.totalorder %s1815_s0, %s1815_s0 }
  0x40   :  { %p1822_p2 = por %p1821_p1, %p1820_p0 }
  0x42   :  { %p1823_p3 = pnand %p1822_p2, %p1816_p13 }
  0x44   :  { %1826 = shalt.err (!%p1823_p3)
}
  0x45   :  { %54 = dma.hbm_to_vmem [thread:$0]  %s2355_s3, 1024, %s49_s25, [#allocation7], %s1880_s15, %s1880_s15, %s1881_s16  }
  0x46   :  { %s1827_s19 = scalar_lea.hbm %s2358_s6, 512 }
  0x47   :  { %p1828_p4 = scmp.ne.s32.totalorder %s2358_s6, %s1827_s19  ;;  %p1831_p5 = scmp.lt.u32.totalorder %s1827_s19, %s2358_s6 }
  0x49   :  { %p1833_p6 = pnand %p1831_p5, %p1828_p4 }
  0x4b   :  { %1836 = shalt.err (!%p1833_p6)
}
  0x4c   :  { %s1837_s24 = scalar_lea.vmem %s75_s27, 512  ;;  %p1842_p8 = scmp.lt.s32.totalorder %s75_s27, %s75_s27 }
  0x4d   :  { %p1838_p7 = scmp.ne.s32.totalorder %s75_s27, %s1837_s24  ;;  %p1843_p9 = scmp.lt.s32.totalorder %s1837_s24, %s1837_s24 }
  0x4f   :  { %p1844_p10 = por %p1843_p9, %p1842_p8 }
  0x51   :  { %p1845_p11 = pnand %p1844_p10, %p1838_p7 }
  0x53   :  { %1848 = shalt.err (!%p1845_p11)
}
  0x54   :  { %80 = dma.hbm_to_vmem [thread:$0]  %s2358_s6, 512, %s75_s27, [#allocation10], %s1884_s28, %s1884_s28, %s1885_s9  }
  0x55   :  { %1871 = dma.done.wait [#allocation4], 512  }
  0x56   :  { %1872 = vsyncadd [#allocation4], 4294966784 }
  0x57   :  { %1873 = dma.done.wait [#allocation7], 2048  }
  0x58   :  { %1874 = vsyncadd [#allocation7], 4294965248 }
  0x59   :  { %1875 = dma.done.wait [#allocation10], 1024  }
  0x5a   :  { %1876 = vsyncadd [#allocation10], 4294966272  ;;  %v1888_v0 = vmov 0   ;;  %v2013_v1 = vld [vmem:[#allocation6 + $0x4] ss:$8 sps:$4 sm:$0xff]   ;;  %vm160_vm0 = vcmask 523264   ;;  %v110_v21 = vlaneseq }
  0x5b   :  { %196 = vmatprep.mubr.bf16.mxu0 %v1888_v0  ;;  %244 = vmatprep.mubr.bf16.mxu1 %v1888_v0  ;;  %v2015_v2 = vld [vmem:[#allocation6] ss:$8 sps:$4 sm:$0xff]   ;;  %v2018_v3 = vld [vmem:[#allocation6 + $0x14] ss:$8 sps:$4 sm:$0xff]   ;;  %v2022_v4 = vld [vmem:[#allocation6 + $0x10] ss:$8 sps:$4 sm:$0xff]  }
  0x5c   :  { %164 = vmatprep.subr.bf16.mxu0 %v2013_v1  ;;  %212 = vmatprep.subr.bf16.mxu1 %v2013_v1  ;;  %v2026_v5 = vld [vmem:[#allocation6 + $0x24] ss:$8 sps:$4 sm:$0xff]   ;;  %v2030_v6 = vld [vmem:[#allocation6 + $0x20] ss:$8 sps:$4 sm:$0xff]   ;;  %v2034_v7 = vld [vmem:[#allocation6 + $0x34] ss:$8 sps:$4 sm:$0xff]  }
  0x5d   :  { %165 = vmatpush1.bf16.msra.mxu0 %v2015_v2  ;;  %213 = vmatpush1.bf16.msra.mxu1 %v2015_v2  ;;  %v2038_v8 = vld [vmem:[#allocation6 + $0x30] ss:$8 sps:$4 sm:$0xff]   ;;  %v108_v9 = vld [vmem:[#allocation3] sm:$0xf]  ;;  %v257_v10 = vld [vmem:[#allocation3 + $0x8] sm:$0xf] }
  0x5e   :  { %166 = vmatprep.subr.bf16.mxu0 %v2018_v3  ;;  %214 = vmatprep.subr.bf16.mxu1 %v2018_v3  ;;  %v355_v11 = vld [vmem:[#allocation3 + $0x10] sm:$0xf]  ;;  %v2075_v12 = vld [vmem:[#allocation8 + $0x4] ss:$8 sps:$4 sm:$0xff]   ;;  %v453_v13 = vld [vmem:[#allocation3 + $0x18] sm:$0xf] }
  0x5f   :  { %v2078_v14 = vld [vmem:[#allocation8] ss:$8 sps:$4 sm:$0xff]   ;;  %v2081_v15 = vld [vmem:[#allocation8 + $0x14] ss:$8 sps:$4 sm:$0xff]   ;;  %v2085_v16 = vld [vmem:[#allocation8 + $0x10] ss:$8 sps:$4 sm:$0xff]  }
  0x60   :  { %v2089_v17 = vld [vmem:[#allocation8 + $0x24] ss:$8 sps:$4 sm:$0xff]   ;;  %v2092_v18 = vld [vmem:[#allocation8 + $0x20] ss:$8 sps:$4 sm:$0xff]   ;;  %v2095_v19 = vld [vmem:[#allocation8 + $0x34] ss:$8 sps:$4 sm:$0xff]  }
  0x61   :  { %167 = vmatpush1.bf16.msra.mxu0 %v2022_v4  ;;  %215 = vmatpush1.bf16.msra.mxu1 %v2022_v4  ;;  %v2098_v20 = vld [vmem:[#allocation8 + $0x30] ss:$8 sps:$4 sm:$0xff]   ;;  %v111_v22 = vshrl.u32 %v110_v21, 7  ;;  %v2113_v23 = vand.u32 127, %v110_v21  ;;  %v107_v25 = vld [vmem:[%s2354_s2] sm:$0x3] }
  0x62   :  { %168 = vmatprep.subr.bf16.mxu0 %v2026_v5  ;;  %216 = vmatprep.subr.bf16.mxu1 %v2026_v5  ;;  %v1889_v32 = vmov 0.5   ;;  %v208_v48 = vld [vmem:[#allocation3 + $0x4] sm:$0xf]  ;;  %v306_v49 = vld [vmem:[#allocation3 + $0xc] sm:$0xf]  ;;  %s1890_s27 = smov [#allocation12]  }
  0x63   :  { %v112_v24 = vsub.s32 0, %v111_v22  ;;  %v116_v26 = vsub.s32 1, %v111_v22  ;;  %v552_v27 = vadd.s32 128, %v2113_v23  ;;  %v404_v50 = vld [vmem:[#allocation3 + $0x14] sm:$0xf]  ;;  %vm1159_vm2 = vcmp.lt.s32.totalorder %v2113_v23, 32 }
  0x64   :  { %v502_v51 = vld [vmem:[#allocation3 + $0x1c] sm:$0xf]  ;;  %s1468_s29 = sshll.u32 %s1890_s27, 4  ;;  %s1469_s29 = int_to_ptr.vmem [resolvable:$true] %s1468_s29 }
  0x65   :  { %169 = vmatpush1.bf16.msra.mxu0 %v2030_v6  ;;  %217 = vmatpush1.bf16.msra.mxu1 %v2030_v6  ;;  %v2119_v28 = vrot.slane %v107_v25, %v112_v24  ;;  %v2121_v29 = vrot.slane %v107_v25, %v116_v26  ;;  %vm556_vm1 = vcmp.lt.s32.totalorder %v552_v27, 192  ;;  %p1854_p13 = scmp.lt.s32.totalorder %s1469_s29, %s1469_s29 }
  0x66   :  { %170 = vmatprep.subr.bf16.mxu0 %v2034_v7  ;;  %218 = vmatprep.subr.bf16.mxu1 %v2034_v7  ;;  %v2124_v33 = vsel %vm556_vm1, 1.0, %v1889_v32  ;;  %v2128_v42 = vsel %vm556_vm1, 0.0, %v1889_v32 }
  0x69   :  { %171 = vmatpush1.bf16.msra.mxu0 %v2038_v8  ;;  %219 = vmatpush1.bf16.msra.mxu1 %v2038_v8 }
  0x6a   :  { %261 = vmatprep.subr.bf16.mxu0 %v2013_v1  ;;  %310 = vmatprep.subr.bf16.mxu1 %v2013_v1 }
  0x6c   :  { %1490 = vmatmul.mubr.msk.bf16.vlgmr.msra.gmra.mrb[0].mxu0 %vm160_vm0, %v108_v9  ;;  %1491 = vmatmul.mubr.msk.bf16.vlgmr.msra.gmra.mrb[0].mxu1 %vm160_vm0, %v208_v48 }
  0x6d   :  { %262 = vmatpush1.bf16.msra.mxu0 %v2015_v2  ;;  %293 = vmatprep.mubr.bf16.mxu0 %v1888_v0 }
  0x6e   :  { %263 = vmatprep.subr.bf16.mxu0 %v2018_v3  ;;  %311 = vmatpush1.bf16.msra.mxu1 %v2015_v2 }
  0x6f   :  { %342 = vmatprep.mubr.bf16.mxu1 %v1888_v0  ;;  %312 = vmatprep.subr.bf16.mxu1 %v2018_v3 }
  0x71   :  { %264 = vmatpush1.bf16.msra.mxu0 %v2022_v4 }
  0x72   :  { %265 = vmatprep.subr.bf16.mxu0 %v2026_v5  ;;  %313 = vmatpush1.bf16.msra.mxu1 %v2022_v4 }
  0x73   :  { %314 = vmatprep.subr.bf16.mxu1 %v2026_v5 }
  0x75   :  { %266 = vmatpush1.bf16.msra.mxu0 %v2030_v6 }
  0x76   :  { %267 = vmatprep.subr.bf16.mxu0 %v2034_v7  ;;  %315 = vmatpush1.bf16.msra.mxu1 %v2030_v6 }
  0x77   :  { %316 = vmatprep.subr.bf16.mxu1 %v2034_v7 }
  0x79   :  { %268 = vmatpush1.bf16.msra.mxu0 %v2038_v8 }
  0x7a   :  { %359 = vmatprep.subr.bf16.mxu0 %v2013_v1  ;;  %317 = vmatpush1.bf16.msra.mxu1 %v2038_v8 }
  0x7b   :  { %408 = vmatprep.subr.bf16.mxu1 %v2013_v1 }
  0x7c   :  { %1492 = vmatmul.mubr.msk.bf16.vlgmr.msra.gmra.mrb[4].mxu0 %vm160_vm0, %v257_v10 }
  0x7d   :  { %360 = vmatpush1.bf16.msra.mxu0 %v2015_v2  ;;  %391 = vmatprep.mubr.bf16.mxu0 %v1888_v0 }
  0x7e   :  { %361 = vmatprep.subr.bf16.mxu0 %v2018_v3  ;;  %1493 = vmatmul.mubr.msk.bf16.vlgmr.msra.gmra.mrb[4].mxu1 %vm160_vm0, %v306_v49 }
  0x7f   :  { %409 = vmatpush1.bf16.msra.mxu1 %v2015_v2  ;;  %440 = vmatprep.mubr.bf16.mxu1 %v1888_v0 }
  0x80   :  { %410 = vmatprep.subr.bf16.mxu1 %v2018_v3 }
  0x81   :  { %362 = vmatpush1.bf16.msra.mxu0 %v2022_v4 }
  0x82   :  { %363 = vmatprep.subr.bf16.mxu0 %v2026_v5 }
  0x83   :  { %411 = vmatpush1.bf16.msra.mxu1 %v2022_v4 }
  0x84   :  { %412 = vmatprep.subr.bf16.mxu1 %v2026_v5 }
  0x85   :  { %364 = vmatpush1.bf16.msra.mxu0 %v2030_v6 }
  0x86   :  { %365 = vmatprep.subr.bf16.mxu0 %v2034_v7 }
  0x87   :  { %413 = vmatpush1.bf16.msra.mxu1 %v2030_v6 }
  0x88   :  { %414 = vmatprep.subr.bf16.mxu1 %v2034_v7 }
  0x89   :  { %366 = vmatpush1.bf16.msra.mxu0 %v2038_v8 }
  0x8a   :  { %457 = vmatprep.subr.bf16.mxu0 %v2013_v1 }
  0x8b   :  { %415 = vmatpush1.bf16.msra.mxu1 %v2038_v8 }
  0x8c   :  { %1494 = vmatmul.mubr.msk.bf16.vlgmr.msra.gmra.mrb[8].mxu0 %vm160_vm0, %v355_v11  ;;  %506 = vmatprep.subr.bf16.mxu1 %v2013_v1 }
  0x8d   :  { %458 = vmatpush1.bf16.msra.mxu0 %v2015_v2  ;;  %489 = vmatprep.mubr.bf16.mxu0 %v1888_v0 }
  0x8e   :  { %459 = vmatprep.subr.bf16.mxu0 %v2018_v3  ;;  %1495 = vmatmul.mubr.msk.bf16.vlgmr.msra.gmra.mrb[8].mxu1 %vm160_vm0, %v404_v50 }
  0x8f   :  { %507 = vmatpush1.bf16.msra.mxu1 %v2015_v2  ;;  %538 = vmatprep.mubr.bf16.mxu1 %v1888_v0 }
  0x90   :  { %508 = vmatprep.subr.bf16.mxu1 %v2018_v3 }
  0x91   :  { %460 = vmatpush1.bf16.msra.mxu0 %v2022_v4 }
  0x92   :  { %461 = vmatprep.subr.bf16.mxu0 %v2026_v5 }
  0x93   :  { %509 = vmatpush1.bf16.msra.mxu1 %v2022_v4 }
  0x94   :  { %510 = vmatprep.subr.bf16.mxu1 %v2026_v5 }
  0x95   :  { %462 = vmatpush1.bf16.msra.mxu0 %v2030_v6 }
  0x96   :  { %463 = vmatprep.subr.bf16.mxu0 %v2034_v7 }
  0x97   :  { %511 = vmatpush1.bf16.msra.mxu1 %v2030_v6 }
  0x98   :  { %512 = vmatprep.subr.bf16.mxu1 %v2034_v7 }
  0x99   :  { %464 = vmatpush1.bf16.msra.mxu0 %v2038_v8 }
  0x9a   :  { %616 = vmatprep.subr.bf16.mxu0 %v2075_v12 }
  0x9b   :  { %513 = vmatpush1.bf16.msra.mxu1 %v2038_v8 }
  0x9c   :  { %1496 = vmatmul.mubr.msk.bf16.vlgmr.msra.gmra.mrb[12].mxu0 %vm160_vm0, %v453_v13  ;;  %685 = vmatprep.subr.bf16.mxu1 %v2075_v12 }
  0x9d   :  { %617 = vmatpush1.bf16.msra.mxu0 %v2078_v14  ;;  %648 = vmatprep.mubr.bf16.mxu0 %v1888_v0 }
  0x9e   :  { %618 = vmatprep.subr.bf16.mxu0 %v2081_v15  ;;  %1497 = vmatmul.mubr.msk.bf16.vlgmr.msra.gmra.mrb[12].mxu1 %vm160_vm0, %v502_v51 }
  0x9f   :  { %686 = vmatpush1.bf16.msra.mxu1 %v2078_v14  ;;  %717 = vmatprep.mubr.bf16.mxu1 %v1888_v0 }
  0xa0   :  { %687 = vmatprep.subr.bf16.mxu1 %v2081_v15 }
  0xa1   :  { %619 = vmatpush1.bf16.msra.mxu0 %v2085_v16 }
  0xa2   :  { %620 = vmatprep.subr.bf16.mxu0 %v2089_v17 }
  0xa3   :  { %688 = vmatpush1.bf16.msra.mxu1 %v2085_v16 }
  0xa4   :  { %689 = vmatprep.subr.bf16.mxu1 %v2089_v17 }
  0xa5   :  { %621 = vmatpush1.bf16.msra.mxu0 %v2092_v18 }
  0xa6   :  { %622 = vmatprep.subr.bf16.mxu0 %v2095_v19 }
  0xa7   :  { %690 = vmatpush1.bf16.msra.mxu1 %v2092_v18 }
  0xa8   :  { %691 = vmatprep.subr.bf16.mxu1 %v2095_v19 }
  0xa9   :  { %623 = vmatpush1.bf16.msra.mxu0 %v2098_v20 }
  0xaa   :  { %754 = vmatprep.subr.bf16.mxu0 %v2075_v12 }
  0xab   :  { %692 = vmatpush1.bf16.msra.mxu1 %v2098_v20 }
  0xac   :  { %649 = vmatmul.mubr.bf16.vlgmr.msra.gmra.mrb[0].mxu0 %v1888_v0  ;;  %823 = vmatprep.subr.bf16.mxu1 %v2075_v12 }
  0xad   :  { %755 = vmatpush1.bf16.msra.mxu0 %v2078_v14  ;;  %786 = vmatprep.mubr.bf16.mxu0 %v1888_v0 }
  0xae   :  { %756 = vmatprep.subr.bf16.mxu0 %v2081_v15 }
  0xb1   :  { %757 = vmatpush1.bf16.msra.mxu0 %v2085_v16 }
  0xb2   :  { %758 = vmatprep.subr.bf16.mxu0 %v2089_v17 }
  0xb5   :  { %759 = vmatpush1.bf16.msra.mxu0 %v2092_v18 }
  0xb6   :  { %760 = vmatprep.subr.bf16.mxu0 %v2095_v19 }
  0xb9   :  { %761 = vmatpush1.bf16.msra.mxu0 %v2098_v20 }
  0xba   :  { %892 = vmatprep.subr.bf16.mxu0 %v2075_v12 }
 0x17f   :  { %v650_v30 = vpop.f32.mrb[0].mxu0 }
 0x180   :  { %v1579_v31 = vadd.f32 %v650_v30, %v2119_v28  ;;  %v652_v34 = vpop.f32.mrb[1].mxu0 }
 0x181   :  { %v1580_v35 = vadd.f32 %v652_v34, %v2121_v29  ;;  %v654_v36 = vpop.f32.mrb[2].mxu0 }
 0x182   :  { %v659_v37 = vmul.f32 0.5, %v1579_v31  ;;  %v655_v38 = vpop.f32.mrb[3].mxu0 }
 0x183   :  { %v660_v39 = vmul.f32 %v1580_v35, %v2124_v33 }
 0x184   :  { %1691 = vtanh.f32 %v659_v37 }
 0x185   :  { %1693 = vtanh.f32 %v660_v39 }
 0x18e   :  { %v1692_v40 = vpop.eup %1691 }
 0x18f   :  { %v1694_v41 = vpop.eup %1693  ;;  %v663_v43 = vmul.f32 0.5, %v1692_v40 }
 0x190   :  { %v664_v44 = vmul.f32 %v1694_v41, %v2124_v33 }
 0x191   :  { %v665_v45 = vadd.f32 0.5, %v663_v43 }
 0x192   :  { %v666_v46 = vadd.f32 %v664_v44, %v2128_v42 }
 0x193   :  { %v667_v52 = vmul.f32 0.0, %v665_v45 }
 0x194   :  { %v668_v47 = vmul.f32 %v666_v46, %v665_v45 }
 0x196   :  { %670 = vrot.lane.b32.xlu0 %v668_v47, %s1884_s28 }
 0x208   :  { %v671_v53 = vpop.permute.xlu0 %670 }
 0x209   :  { %v673_v54 = vadd.f32 %v671_v53, %v667_v52 }
 0x20b   :  { %1695 = vtanh.f32 %v673_v54 }
 0x215   :  { %v1696_v55 = vpop.eup %1695 }
 0x216   :  { %v2173_v56 = vmul.f32 %v1696_v55, %v666_v46 }
 0x218   :  { %v678_v57 = vpack.c.bf16 %v2173_v56, %v2173_v56 }
 0x21a   :  { %680 = vrot.lane.b32.xlu0 %v678_v57, %s1884_s28 }
 0x28c   :  { %v681_v58 = vpop.permute.xlu0 %680 }
 0x28d   :  { %1506 = vmatmul.mubr.msk.bf16.vlgmr.msra.gmra.mrb[0].mxu1 %vm160_vm0, %v681_v58 }
 0x28e   :  { %824 = vmatpush1.bf16.msra.mxu1 %v2078_v14  ;;  %855 = vmatprep.mubr.bf16.mxu1 %v1888_v0 }
 0x28f   :  { %825 = vmatprep.subr.bf16.mxu1 %v2081_v15 }
 0x292   :  { %826 = vmatpush1.bf16.msra.mxu1 %v2085_v16 }
 0x293   :  { %827 = vmatprep.subr.bf16.mxu1 %v2089_v17 }
 0x296   :  { %828 = vmatpush1.bf16.msra.mxu1 %v2092_v18 }
 0x297   :  { %829 = vmatprep.subr.bf16.mxu1 %v2095_v19 }
 0x29a   :  { %830 = vmatpush1.bf16.msra.mxu1 %v2098_v20 }
 0x29b   :  { %961 = vmatprep.subr.bf16.mxu1 %v2075_v12 }
 0x360   :  { %v719_v59 = vpop.f32.mrb[0].mxu1 }
 0x361   :  { %v1581_v60 = vadd.f32 %v719_v59, %v2119_v28  ;;  %v721_v61 = vpop.f32.mrb[1].mxu1 }
 0x362   :  { %v1582_v62 = vadd.f32 %v721_v61, %v2121_v29  ;;  %v723_v63 = vpop.f32.mrb[2].mxu1 }
 0x363   :  { %v728_v1 = vmul.f32 0.5, %v1581_v60  ;;  %v724_v2 = vpop.f32.mrb[3].mxu1 }
 0x364   :  { %v729_v3 = vmul.f32 %v1582_v62, %v2124_v33 }
 0x365   :  { %1697 = vtanh.f32 %v728_v1 }
 0x366   :  { %1699 = vtanh.f32 %v729_v3 }
 0x36f   :  { %v1698_v4 = vpop.eup %1697 }
 0x370   :  { %v1700_v5 = vpop.eup %1699  ;;  %v732_v6 = vmul.f32 0.5, %v1698_v4 }
 0x371   :  { %v733_v7 = vmul.f32 %v1700_v5, %v2124_v33 }
 0x372   :  { %v734_v8 = vadd.f32 0.5, %v732_v6 }
 0x373   :  { %v735_v9 = vadd.f32 %v733_v7, %v2128_v42 }
 0x374   :  { %v736_v11 = vmul.f32 %v734_v8, %v673_v54 }
 0x375   :  { %v737_v10 = vmul.f32 %v735_v9, %v734_v8 }
 0x377   :  { %739 = vrot.lane.b32.xlu1 %v737_v10, %s1884_s28 }
 0x3e9   :  { %v740_v13 = vpop.permute.xlu1 %739 }
 0x3ea   :  { %v742_v21 = vadd.f32 %v740_v13, %v736_v11 }
 0x3ec   :  { %1701 = vtanh.f32 %v742_v21 }
 0x3f6   :  { %v1702_v22 = vpop.eup %1701 }
 0x3f7   :  { %v2194_v24 = vmul.f32 %v1702_v22, %v735_v9 }
 0x3f9   :  { %v747_v25 = vpack.c.bf16 %v2194_v24, %v2194_v24 }
 0x3fb   :  { %749 = vrot.lane.b32.xlu1 %v747_v25, %s1884_s28 }
 0x46d   :  { %v750_v26 = vpop.permute.xlu1 %749 }
 0x46e   :  { %1507 = vmatmul.mubr.msk.bf16.vlgmr.msra.gmra.mrb[4].mxu0 %vm160_vm0, %v750_v26 }
 0x46f   :  { %893 = vmatpush1.bf16.msra.mxu0 %v2078_v14  ;;  %924 = vmatprep.mubr.bf16.mxu0 %v1888_v0 }
 0x470   :  { %894 = vmatprep.subr.bf16.mxu0 %v2081_v15 }
 0x473   :  { %895 = vmatpush1.bf16.msra.mxu0 %v2085_v16 }
 0x474   :  { %896 = vmatprep.subr.bf16.mxu0 %v2089_v17 }
 0x477   :  { %897 = vmatpush1.bf16.msra.mxu0 %v2092_v18 }
 0x478   :  { %898 = vmatprep.subr.bf16.mxu0 %v2095_v19 }
 0x47b   :  { %899 = vmatpush1.bf16.msra.mxu0 %v2098_v20 }
 0x47c   :  { %1030 = vmatprep.subr.bf16.mxu0 %v2075_v12 }
 0x541   :  { %v788_v27 = vpop.f32.mrb[4].mxu0 }
 0x542   :  { %v1583_v30 = vadd.f32 %v788_v27, %v2119_v28  ;;  %v790_v31 = vpop.f32.mrb[5].mxu0 }
 0x543   :  { %v1584_v32 = vadd.f32 %v790_v31, %v2121_v29  ;;  %v792_v34 = vpop.f32.mrb[6].mxu0 }
 0x544   :  { %v797_v35 = vmul.f32 0.5, %v1583_v30  ;;  %v793_v36 = vpop.f32.mrb[7].mxu0 }
 0x545   :  { %v798_v37 = vmul.f32 %v1584_v32, %v2124_v33 }
 0x546   :  { %1703 = vtanh.f32 %v797_v35 }
 0x547   :  { %1705 = vtanh.f32 %v798_v37 }
 0x550   :  { %v1704_v38 = vpop.eup %1703 }
 0x551   :  { %v1706_v39 = vpop.eup %1705  ;;  %v801_v40 = vmul.f32 0.5, %v1704_v38 }
 0x552   :  { %v802_v41 = vmul.f32 %v1706_v39, %v2124_v33 }
 0x553   :  { %v803_v43 = vadd.f32 0.5, %v801_v40 }
 0x554   :  { %v804_v44 = vadd.f32 %v802_v41, %v2128_v42 }
 0x555   :  { %v805_v46 = vmul.f32 %v803_v43, %v742_v21 }
 0x556   :  { %v806_v45 = vmul.f32 %v804_v44, %v803_v43 }
 0x558   :  { %808 = vrot.lane.b32.xlu0 %v806_v45, %s1884_s28 }
 0x5ca   :  { %v809_v47 = vpop.permute.xlu0 %808 }
 0x5cb   :  { %v811_v48 = vadd.f32 %v809_v47, %v805_v46 }
 0x5cd   :  { %1707 = vtanh.f32 %v811_v48 }
 0x5d7   :  { %v1708_v49 = vpop.eup %1707 }
 0x5d8   :  { %v2215_v50 = vmul.f32 %v1708_v49, %v804_v44 }
 0x5da   :  { %v816_v51 = vpack.c.bf16 %v2215_v50, %v2215_v50 }
 0x5dc   :  { %818 = vrot.lane.b32.xlu1 %v816_v51, %s1884_s28 }
 0x64e   :  { %v819_v52 = vpop.permute.xlu1 %818 }
 0x64f   :  { %1508 = vmatmul.mubr.msk.bf16.vlgmr.msra.gmra.mrb[4].mxu1 %vm160_vm0, %v819_v52 }
 0x650   :  { %962 = vmatpush1.bf16.msra.mxu1 %v2078_v14  ;;  %993 = vmatprep.mubr.bf16.mxu1 %v1888_v0 }
 0x651   :  { %963 = vmatprep.subr.bf16.mxu1 %v2081_v15 }
 0x654   :  { %964 = vmatpush1.bf16.msra.mxu1 %v2085_v16 }
 0x655   :  { %965 = vmatprep.subr.bf16.mxu1 %v2089_v17 }
 0x658   :  { %966 = vmatpush1.bf16.msra.mxu1 %v2092_v18 }
 0x659   :  { %967 = vmatprep.subr.bf16.mxu1 %v2095_v19 }
 0x65c   :  { %968 = vmatpush1.bf16.msra.mxu1 %v2098_v20 }
 0x65d   :  { %1099 = vmatprep.subr.bf16.mxu1 %v2075_v12 }
 0x722   :  { %v857_v53 = vpop.f32.mrb[4].mxu1 }
 0x723   :  { %v1585_v54 = vadd.f32 %v857_v53, %v2119_v28  ;;  %v859_v55 = vpop.f32.mrb[5].mxu1 }
 0x724   :  { %v1586_v57 = vadd.f32 %v859_v55, %v2121_v29  ;;  %v861_v58 = vpop.f32.mrb[6].mxu1 }
 0x725   :  { %v866_v59 = vmul.f32 0.5, %v1585_v54  ;;  %v862_v60 = vpop.f32.mrb[7].mxu1 }
 0x726   :  { %v867_v61 = vmul.f32 %v1586_v57, %v2124_v33 }
 0x727   :  { %1709 = vtanh.f32 %v866_v59 }
 0x728   :  { %1711 = vtanh.f32 %v867_v61 }
 0x731   :  { %v1710_v62 = vpop.eup %1709 }
 0x732   :  { %v1712_v63 = vpop.eup %1711  ;;  %v870_v1 = vmul.f32 0.5, %v1710_v62 }
 0x733   :  { %v871_v2 = vmul.f32 %v1712_v63, %v2124_v33 }
 0x734   :  { %v872_v3 = vadd.f32 0.5, %v870_v1 }
 0x735   :  { %v873_v12 = vadd.f32 %v871_v2, %v2128_v42 }
 0x736   :  { %v874_v5 = vmul.f32 %v872_v3, %v811_v48 }
 0x737   :  { %v875_v4 = vmul.f32 %v873_v12, %v872_v3 }
 0x739   :  { %877 = vrot.lane.b32.xlu0 %v875_v4, %s1884_s28 }
 0x7ab   :  { %v878_v6 = vpop.permute.xlu0 %877 }
 0x7ac   :  { %v880_v7 = vadd.f32 %v878_v6, %v874_v5 }
 0x7ae   :  { %1713 = vtanh.f32 %v880_v7 }
 0x7b8   :  { %v1714_v8 = vpop.eup %1713 }
 0x7b9   :  { %v2236_v9 = vmul.f32 %v1714_v8, %v873_v12 }
 0x7bb   :  { %v885_v10 = vpack.c.bf16 %v2236_v9, %v2236_v9 }
 0x7bd   :  { %887 = vrot.lane.b32.xlu1 %v885_v10, %s1884_s28 }
 0x82f   :  { %v888_v11 = vpop.permute.xlu1 %887 }
 0x830   :  { %1509 = vmatmul.mubr.msk.bf16.vlgmr.msra.gmra.mrb[8].mxu0 %vm160_vm0, %v888_v11 }
 0x831   :  { %1031 = vmatpush1.bf16.msra.mxu0 %v2078_v14  ;;  %1062 = vmatprep.mubr.bf16.mxu0 %v1888_v0 }
 0x832   :  { %1032 = vmatprep.subr.bf16.mxu0 %v2081_v15 }
 0x835   :  { %1033 = vmatpush1.bf16.msra.mxu0 %v2085_v16 }
 0x836   :  { %1034 = vmatprep.subr.bf16.mxu0 %v2089_v17 }
 0x839   :  { %1035 = vmatpush1.bf16.msra.mxu0 %v2092_v18 }
 0x83a   :  { %1036 = vmatprep.subr.bf16.mxu0 %v2095_v19 }
 0x83d   :  { %1037 = vmatpush1.bf16.msra.mxu0 %v2098_v20 }
 0x903   :  { %v926_v13 = vpop.f32.mrb[8].mxu0 }
 0x904   :  { %v1587_v21 = vadd.f32 %v926_v13, %v2119_v28  ;;  %v928_v22 = vpop.f32.mrb[9].mxu0 }
 0x905   :  { %v1588_v25 = vadd.f32 %v928_v22, %v2121_v29  ;;  %v930_v26 = vpop.f32.mrb[10].mxu0 }
 0x906   :  { %v935_v27 = vmul.f32 0.5, %v1587_v21  ;;  %v931_v30 = vpop.f32.mrb[11].mxu0 }
 0x907   :  { %v936_v31 = vmul.f32 %v1588_v25, %v2124_v33 }
 0x908   :  { %1715 = vtanh.f32 %v935_v27 }
 0x909   :  { %1717 = vtanh.f32 %v936_v31 }
 0x912   :  { %v1716_v32 = vpop.eup %1715 }
 0x913   :  { %v1718_v34 = vpop.eup %1717  ;;  %v939_v35 = vmul.f32 0.5, %v1716_v32 }
 0x914   :  { %v940_v36 = vmul.f32 %v1718_v34, %v2124_v33 }
 0x915   :  { %v941_v37 = vadd.f32 0.5, %v939_v35 }
 0x916   :  { %v942_v38 = vadd.f32 %v940_v36, %v2128_v42 }
 0x917   :  { %v943_v40 = vmul.f32 %v941_v37, %v880_v7 }
 0x918   :  { %v944_v39 = vmul.f32 %v942_v38, %v941_v37 }
 0x91a   :  { %946 = vrot.lane.b32.xlu0 %v944_v39, %s1884_s28 }
 0x98c   :  { %v947_v41 = vpop.permute.xlu0 %946 }
 0x98d   :  { %v949_v43 = vadd.f32 %v947_v41, %v943_v40 }
 0x98f   :  { %1719 = vtanh.f32 %v949_v43 }
 0x999   :  { %v1720_v44 = vpop.eup %1719 }
 0x99a   :  { %v2256_v45 = vmul.f32 %v1720_v44, %v942_v38 }
 0x99c   :  { %v954_v46 = vpack.c.bf16 %v2256_v45, %v2256_v45 }
 0x99e   :  { %956 = vrot.lane.b32.xlu1 %v954_v46, %s1884_s28 }
 0xa10   :  { %v957_v47 = vpop.permute.xlu1 %956 }
 0xa11   :  { %1510 = vmatmul.mubr.msk.bf16.vlgmr.msra.gmra.mrb[8].mxu1 %vm160_vm0, %v957_v47 }
 0xa12   :  { %1100 = vmatpush1.bf16.msra.mxu1 %v2078_v14  ;;  %1131 = vmatprep.mubr.bf16.mxu1 %v1888_v0 }
 0xa13   :  { %1101 = vmatprep.subr.bf16.mxu1 %v2081_v15 }
 0xa16   :  { %1102 = vmatpush1.bf16.msra.mxu1 %v2085_v16 }
 0xa17   :  { %1103 = vmatprep.subr.bf16.mxu1 %v2089_v17 }
 0xa1a   :  { %1104 = vmatpush1.bf16.msra.mxu1 %v2092_v18 }
 0xa1b   :  { %1105 = vmatprep.subr.bf16.mxu1 %v2095_v19 }
 0xa1e   :  { %1106 = vmatpush1.bf16.msra.mxu1 %v2098_v20 }
 0xae4   :  { %v995_v48 = vpop.f32.mrb[8].mxu1 }
 0xae5   :  { %v1589_v49 = vadd.f32 %v995_v48, %v2119_v28  ;;  %v997_v51 = vpop.f32.mrb[9].mxu1 }
 0xae6   :  { %v1590_v14 = vadd.f32 %v997_v51, %v2121_v29  ;;  %v999_v52 = vpop.f32.mrb[10].mxu1 }
 0xae7   :  { %v1004_v0 = vmul.f32 0.5, %v1589_v49  ;;  %v1000_v53 = vpop.f32.mrb[11].mxu1 }
 0xae8   :  { %v1005_v15 = vmul.f32 %v1590_v14, %v2124_v33  ;;  %v1684_v53 = vld [vmem:[#allocation9 + $0x8] sm:$0xff]  }
 0xae9   :  { %1721 = vtanh.f32 %v1004_v0  ;;  %v1683_v0 = vld [vmem:[#allocation9] sm:$0xff]  }
 0xaea   :  { %1723 = vtanh.f32 %v1005_v15  ;;  %1547 = vmatprep.subr.bf16.mxu0 %v1683_v0 }
 0xaf3   :  { %v1722_v16 = vpop.eup %1721 }
 0xaf4   :  { %v1724_v17 = vpop.eup %1723  ;;  %v1008_v18 = vmul.f32 0.5, %v1722_v16  ;;  %v1685_v16 = vld [vmem:[#allocation9 + $0x10] sm:$0xff]  }
 0xaf5   :  { %v1009_v19 = vmul.f32 %v1724_v17, %v2124_v33 }
 0xaf6   :  { %v1010_v54 = vadd.f32 0.5, %v1008_v18 }
 0xaf7   :  { %v1011_v20 = vadd.f32 %v1009_v19, %v2128_v42  ;;  %v1687_v19 = vld [vmem:[#allocation11] sm:$0xff]  }
 0xaf8   :  { %v1012_v57 = vmul.f32 %v1010_v54, %v949_v43  ;;  %1563 = vmatprep.subr.bf16.mxu1 %v1687_v19 }
 0xaf9   :  { %v1013_v55 = vmul.f32 %v1011_v20, %v1010_v54  ;;  %v1688_v54 = vld [vmem:[#allocation11 + $0x8] sm:$0xff]  }
 0xafb   :  { %1015 = vrot.lane.b32.xlu0 %v1013_v55, %s1884_s28 }
 0xb6d   :  { %v1016_v58 = vpop.permute.xlu0 %1015 }
 0xb6e   :  { %v1018_v59 = vadd.f32 %v1016_v58, %v1012_v57 }
 0xb70   :  { %1725 = vtanh.f32 %v1018_v59 }
 0xb7a   :  { %v1726_v60 = vpop.eup %1725 }
 0xb7b   :  { %v2276_v61 = vmul.f32 %v1726_v60, %v1011_v20 }
 0xb7d   :  { %v1023_v62 = vpack.c.bf16 %v2276_v61, %v2276_v61  ;;  %v1649_v18 = vpack.i.bf16 %v2276_v61, %v2215_v50 }
 0xb7f   :  { %1025 = vrot.lane.b32.xlu1 %v1023_v62, %s1884_s28 }
 0xbf1   :  { %v1026_v63 = vpop.permute.xlu1 %1025 }
 0xbf2   :  { %1511 = vmatmul.mubr.msk.bf16.vlgmr.msra.gmra.mrb[12].mxu0 %vm160_vm0, %v1026_v63 }
 0xbf3   :  { %1548 = vmatpush3.bf16.msra.mxu0 %v1683_v0 }
 0xbf4   :  { %1549 = vmatprep.subr.bf16.mxu0 %v1684_v53 }
 0xbf7   :  { %1550 = vmatpush3.bf16.msra.mxu0 %v1684_v53 }
 0xbf8   :  { %1551 = vmatprep.subr.bf16.mxu0 %v1685_v16 }
 0xbfb   :  { %1552 = vmatpush3.bf16.msra.mxu0 %v1685_v16 }
 0xcc5   :  { %v1064_v1 = vpop.f32.mrb[12].mxu0 }
 0xcc6   :  { %v1591_v2 = vadd.f32 %v1064_v1, %v2119_v28  ;;  %v1066_v3 = vpop.f32.mrb[13].mxu0 }
 0xcc7   :  { %v1592_v12 = vadd.f32 %v1066_v3, %v2121_v29  ;;  %v1068_v4 = vpop.f32.mrb[14].mxu0 }
 0xcc8   :  { %v1073_v5 = vmul.f32 0.5, %v1591_v2  ;;  %v1069_v6 = vpop.f32.mrb[15].mxu0 }
 0xcc9   :  { %v1074_v7 = vmul.f32 %v1592_v12, %v2124_v33 }
 0xcca   :  { %1727 = vtanh.f32 %v1073_v5 }
 0xccb   :  { %1729 = vtanh.f32 %v1074_v7 }
 0xcd4   :  { %v1728_v8 = vpop.eup %1727 }
 0xcd5   :  { %v1730_v10 = vpop.eup %1729  ;;  %v1077_v11 = vmul.f32 0.5, %v1728_v8 }
 0xcd6   :  { %v1078_v13 = vmul.f32 %v1730_v10, %v2124_v33 }
 0xcd7   :  { %v1079_v21 = vadd.f32 0.5, %v1077_v11 }
 0xcd8   :  { %v1080_v22 = vadd.f32 %v1078_v13, %v2128_v42 }
 0xcd9   :  { %v1081_v26 = vmul.f32 %v1079_v21, %v1018_v59 }
 0xcda   :  { %v1082_v25 = vmul.f32 %v1080_v22, %v1079_v21 }
 0xcdc   :  { %1084 = vrot.lane.b32.xlu0 %v1082_v25, %s1884_s28  ;;  %v1690_v25 = vld [vmem:[#allocation11 + $0x18] sm:$0xff]  }
 0xd4e   :  { %v1085_v27 = vpop.permute.xlu0 %1084 }
 0xd4f   :  { %v1087_v30 = vadd.f32 %v1085_v27, %v1081_v26  ;;  %v1513_v26 = vld [vmem:[%s2357_s5] ss:$0 sm:$0xff] }
 0xd51   :  { %1731 = vtanh.f32 %v1087_v30 }
 0xd5b   :  { %v1732_v31 = vpop.eup %1731 }
 0xd5c   :  { %v1089_v32 = vmul.f32 %v1732_v31, %v1080_v22  ;;  %v1689_v22 = vld [vmem:[#allocation11 + $0x10] sm:$0xff]  }
 0xd5e   :  { %v1092_v34 = vpack.c.bf16 %v1089_v32, %v1089_v32 }
 0xd60   :  { %1094 = vrot.lane.b32.xlu1 %v1092_v34, %s1884_s28 }
 0xdd2   :  { %v1095_v35 = vpop.permute.xlu1 %1094 }
 0xdd3   :  { %1512 = vmatmul.mubr.msk.bf16.vlgmr.msra.gmra.mrb[12].mxu1 %vm160_vm0, %v1095_v35 }
 0xdd4   :  { %1564 = vmatpush3.bf16.msra.mxu1 %v1687_v19 }
 0xdd5   :  { %1565 = vmatprep.subr.bf16.mxu1 %v1688_v54 }
 0xdd8   :  { %1566 = vmatpush3.bf16.msra.mxu1 %v1688_v54 }
 0xdd9   :  { %1567 = vmatprep.subr.bf16.mxu1 %v1689_v22 }
 0xddc   :  { %1568 = vmatpush3.bf16.msra.mxu1 %v1689_v22 }
 0xddd   :  { %1569 = vmatprep.subr.bf16.mxu1 %v1690_v25 }
 0xde0   :  { %1570 = vmatpush3.bf16.msra.mxu1 %v1690_v25 }
 0xea6   :  { %v1133_v36 = vpop.f32.mrb[12].mxu1 }
 0xea7   :  { %v1593_v37 = vadd.f32 %v1133_v36, %v2119_v28  ;;  %v1135_v38 = vpop.f32.mrb[13].mxu1  ;;  %v1639_v28 = vpack.i.bf16 %v1089_v32, %v2194_v24  ;;  %v1686_v24 = vld [vmem:[#allocation9 + $0x18] sm:$0xff]  }
 0xea8   :  { %v1594_v39 = vadd.f32 %v1135_v38, %v2121_v29  ;;  %v1137_v40 = vpop.f32.mrb[14].mxu1  ;;  %v1654_v29 = vpack.i.bf16 %v2256_v45, %v2236_v9  ;;  %1553 = vmatprep.subr.bf16.mxu0 %v1686_v24 }
 0xea9   :  { %v1142_v41 = vmul.f32 0.5, %v1593_v37  ;;  %v1138_v43 = vpop.f32.mrb[15].mxu1  ;;  %1554 = vmatpush3.bf16.msra.mxu0 %v1686_v24 }
 0xeaa   :  { %v1143_v44 = vmul.f32 %v1594_v39, %v2124_v33 }
 0xeab   :  { %1733 = vtanh.f32 %v1142_v41 }
 0xeac   :  { %1735 = vtanh.f32 %v1143_v44 }
 0xeb5   :  { %v1734_v46 = vpop.eup %1733 }
 0xeb6   :  { %v1736_v47 = vpop.eup %1735  ;;  %v1146_v48 = vmul.f32 0.5, %v1734_v46 }
 0xeb7   :  { %v1147_v49 = vmul.f32 %v1736_v47, %v2124_v33 }
 0xeb8   :  { %v1148_v51 = vadd.f32 0.5, %v1146_v48 }
 0xeb9   :  { %v1149_v14 = vadd.f32 %v1147_v49, %v2128_v42 }
 0xeba   :  { %v1150_v33 = vmul.f32 %v1148_v51, %v1087_v30 }
 0xebb   :  { %v1151_v52 = vmul.f32 %v1149_v14, %v1148_v51 }
 0xebd   :  { %1153 = vrot.lane.b32.xlu0 %v1151_v52, %s1884_s28 }
 0xec1   :  { %1640 = vrot.lane.b32.xlu0 %v1639_v28, %s1884_s28 }
 0xec5   :  { %1655 = vrot.lane.b32.xlu0 %v1654_v29, %s1884_s28 }
 0xf2f   :  { %v1154_v42 = vpop.permute.xlu0 %1153 }
 0xf30   :  { %v1156_v15 = vadd.f32 %v1154_v42, %v1150_v33 }
 0xf32   :  { %1737 = vtanh.f32 %v1156_v15  ;;  %v1522_v15 = vld [vmem:[%s2359_s7] ss:$0 sm:$0xff]  ;;  %s1849_s7 = scalar_lea.vmem %s1469_s29, 1024 }
 0xf33   :  { %v1641_v20 = vpop.permute.xlu0 %1640  ;;  %p1850_p12 = scmp.ne.s32.totalorder %s1469_s29, %s1849_s7  ;;  %p1855_p0 = scmp.lt.s32.totalorder %s1849_s7, %s1849_s7 }
 0xf34   :  { %v1643_v55 = vunpack.i.h.bf16 %v1641_v20  ;;  %v1642_v57 = vunpack.i.l.bf16 %v1641_v20 }
 0xf35   :  { %p1856_p1 = por %p1855_p0, %p1854_p13 }
 0xf36   :  { %v1177_v50 = vsel %vm1159_vm2, %v1642_v57, %v1643_v55  ;;  %v1198_v13 = vsel %vm1159_vm2, %v1643_v55, %v1642_v57 }
 0xf37   :  { %v1656_v58 = vpop.permute.xlu0 %1655  ;;  %p1857_p2 = pnand %p1856_p1, %p1850_p12 }
 0xf38   :  { %v1658_v61 = vunpack.i.h.bf16 %v1656_v58  ;;  %v1657_v62 = vunpack.i.l.bf16 %v1656_v58 }
 0xf3a   :  { %v1195_v4 = vsel %vm1159_vm2, %v1657_v62, %v1658_v61  ;;  %v1196_v5 = vsel %vm1159_vm2, %v1658_v61, %v1657_v62 }
 0xf3c   :  { %v1738_v17 = vpop.eup %1737 }
 0xf3d   :  { %v1158_v9 = vmul.f32 %v1738_v17, %v1149_v14 }
 0xf3f   :  { %v1644_v45 = vpack.i.bf16 %v1158_v9, %v2173_v56 }
 0xf41   :  { %1645 = vrot.lane.b32.xlu1 %v1644_v45, %s1884_s28 }
 0xf45   :  { %1650 = vrot.lane.b32.xlu1 %v1649_v18, %s1884_s28 }
 0xfb3   :  { %v1646_v56 = vpop.permute.xlu1 %1645 }
 0xfb4   :  { %v1648_v59 = vunpack.i.h.bf16 %v1646_v56  ;;  %v1647_v60 = vunpack.i.l.bf16 %v1646_v56 }
 0xfb6   :  { %v1168_v63 = vsel %vm1159_vm2, %v1647_v60, %v1648_v59  ;;  %v1199_v11 = vsel %vm1159_vm2, %v1648_v59, %v1647_v60 }
 0xfb7   :  { %v1200_v1 = vpack.c.bf16 %v1177_v50, %v1168_v63  ;;  %v1651_v2 = vpop.permute.xlu1 %1650  ;;  %v1203_v21 = vpack.c.bf16 %v1199_v11, %v1198_v13 }
 0xfb8   :  { %v1653_v3 = vunpack.i.h.bf16 %v1651_v2  ;;  %v1652_v12 = vunpack.i.l.bf16 %v1651_v2 }
 0xfb9   :  { %1555 = vmatprep.mubr.msk.bf16.mxu0 %vm160_vm0, %v1200_v1 }
 0xfba   :  { %v1186_v6 = vsel %vm1159_vm2, %v1652_v12, %v1653_v3  ;;  %v1197_v7 = vsel %vm1159_vm2, %v1653_v3, %v1652_v12 }
 0xfbb   :  { %v1201_v8 = vpack.c.bf16 %v1195_v4, %v1186_v6  ;;  %v1202_v10 = vpack.c.bf16 %v1197_v7, %v1196_v5 }
 0xfbd   :  { %1556 = vmatmul.mubr.msk.bf16.vlgmr.msra.gmra.mrb[16].mxu0 %vm160_vm0, %v1201_v8 }
 0xfbe   :  { %1559 = vmatprep.mubr.msk.bf16.mxu0 %vm160_vm0, %v1202_v10 }
 0xfc5   :  { %1560 = vmatmul.mubr.msk.bf16.gmra.mrb[20].mxu0 %vm160_vm0, %v1203_v21 }
0x1090   :  { %v1557_v27 = vpop.f32.mrb[16].mxu0 }
0x1091   :  { %v1298_v30 = vadd.f32 %v1557_v27, %v1513_v26  ;;  %v1289_v31 = vpop.f32.mrb[17].mxu0 }
0x1092   :  { %v1290_v32 = vadd.f32 %v1513_v26, %v1289_v31  ;;  %v1558_v34 = vpop.f32.mrb[18].mxu0 }
0x1093   :  { %v1301_v23 = vadd.f32 %v1558_v34, %v1513_v26  ;;  %v1292_v35 = vpop.f32.mrb[19].mxu0  ;;  %v1322_v37 = vmax.f32 %v1298_v30, 0.0 }
0x1094   :  { %v1293_v36 = vadd.f32 %v1513_v26, %v1292_v35  ;;  %v1320_v39 = vmax.f32 %v1290_v32, 0.0 }
0x1095   :  { %v1323_v38 = vmax.f32 %v1301_v23, 0.0 }
0x1096   :  { %v1321_v40 = vmax.f32 %v1293_v36, 0.0 }
0x1097   :  { %v1329_v41 = vpack.c.bf16 %v1323_v38, %v1322_v37 }
0x1098   :  { %v1328_v43 = vpack.c.bf16 %v1321_v40, %v1320_v39  ;;  %v1561_v44 = vpop.f32.mrb[20].mxu0 }
0x1099   :  { %v1314_v46 = vadd.f32 %v1561_v44, %v1513_v26  ;;  %v1305_v47 = vpop.f32.mrb[21].mxu0 }
0x109a   :  { %v1306_v48 = vadd.f32 %v1513_v26, %v1305_v47  ;;  %v1562_v49 = vpop.f32.mrb[22].mxu0  ;;  %1571 = vmatprep.mubr.msk.bf16.mxu1 %vm160_vm0, %v1328_v43 }
0x109b   :  { %v1317_v51 = vadd.f32 %v1562_v49, %v1513_v26  ;;  %v1308_v14 = vpop.f32.mrb[23].mxu0  ;;  %1572 = vmatmul.mubr.msk.bf16.vlgmr.msra.gmra.mrb[16].mxu1 %vm160_vm0, %v1329_v41  ;;  %v1326_v28 = vmax.f32 %v1314_v46, 0.0 }
0x109c   :  { %v1309_v52 = vadd.f32 %v1513_v26, %v1308_v14  ;;  %v1324_v0 = vmax.f32 %v1306_v48, 0.0 }
0x109d   :  { %v1327_v29 = vmax.f32 %v1317_v51, 0.0 }
0x109e   :  { %v1325_v53 = vmax.f32 %v1309_v52, 0.0 }
0x109f   :  { %v1331_v33 = vpack.c.bf16 %v1327_v29, %v1326_v28 }
0x10a0   :  { %v1330_v42 = vpack.c.bf16 %v1325_v53, %v1324_v0 }
0x10a2   :  { %1575 = vmatprep.mubr.msk.bf16.mxu1 %vm160_vm0, %v1330_v42 }
0x10a3   :  { %1576 = vmatmul.mubr.msk.bf16.gmra.mrb[20].mxu1 %vm160_vm0, %v1331_v33 }
0x116e   :  { %v1573_v16 = vpop.f32.mrb[16].mxu1 }
0x116f   :  { %v1426_v24 = vadd.f32 %v1573_v16, %v1522_v15  ;;  %v1417_v17 = vpop.f32.mrb[17].mxu1 }
0x1170   :  { %v1418_v9 = vadd.f32 %v1522_v15, %v1417_v17  ;;  %v1574_v45 = vpop.f32.mrb[18].mxu1 }
0x1171   :  { %1452 = vst [vmem:[#allocation12 + $0x10] sm:$0xff] %v1426_v24  ;;  %v1429_v18 = vadd.f32 %v1574_v45, %v1522_v15  ;;  %v1420_v19 = vpop.f32.mrb[19].mxu1 }
0x1172   :  { %1448 = vst [vmem:[#allocation12] sm:$0xff] %v1418_v9  ;;  %v1421_v54 = vadd.f32 %v1522_v15, %v1420_v19 }
0x1173   :  { %1454 = vst [vmem:[#allocation12 + $0x18] sm:$0xff] %v1429_v18 }
0x1174   :  { %1450 = vst [vmem:[#allocation12 + $0x8] sm:$0xff] %v1421_v54 }
0x1176   :  { %v1577_v20 = vpop.f32.mrb[20].mxu1 }
0x1177   :  { %v1442_v55 = vadd.f32 %v1577_v20, %v1522_v15  ;;  %v1433_v57 = vpop.f32.mrb[21].mxu1 }
0x1178   :  { %v1434_v58 = vadd.f32 %v1522_v15, %v1433_v57  ;;  %v1578_v56 = vpop.f32.mrb[22].mxu1 }
0x1179   :  { %1460 = vst [vmem:[#allocation12 + $0x30] sm:$0xff] %v1442_v55  ;;  %v1445_v59 = vadd.f32 %v1578_v56, %v1522_v15  ;;  %v1436_v60 = vpop.f32.mrb[23].mxu1 }
0x117a   :  { %1456 = vst [vmem:[#allocation12 + $0x20] sm:$0xff] %v1434_v58  ;;  %v1437_v50 = vadd.f32 %v1522_v15, %v1436_v60 }
0x117b   :  { %1462 = vst [vmem:[#allocation12 + $0x38] sm:$0xff] %v1445_v59 }
0x117c   :  { %1458 = vst [vmem:[#allocation12 + $0x28] sm:$0xff] %v1437_v50 }
0x117d   :  { %1860 = shalt.err (!%p1857_p2)
}
0x117e   :  { %s1861_s10 = scalar_lea.hbm %s2360_s8, 1024 }
0x117f   :  { %p1862_p3 = scmp.ne.s32.totalorder %s2360_s8, %s1861_s10  ;;  %p1865_p4 = scmp.lt.u32.totalorder %s1861_s10, %s2360_s8 }
0x1181   :  { %p1867_p5 = pnand %p1865_p4, %p1862_p3 }
0x1183   :  { %1870 = shalt.err (!%p1867_p5)
}
0x1184   :  { %1474 = dma.vmem_to_hbm [thread:$0]  %s1469_s29, 1024, %s2360_s8, [#allocation5], %s1880_s15, %s1880_s15, %s1881_s16  }
0x1185   :  { %1877 = dma.done.wait [#allocation5], 1024  }
0x1186   :  { %1878 = vsyncadd [#allocation5], 4294966272 }
0x1187   :  { %1478 = vsyncpa [#allocation4], 1 }
0x1188   :  { %1479 = vsyncpa [#allocation7], 1 }
0x1189   :  { %1480 = vsyncpa [#allocation10], 1 }
0x118a   :  { %1481 = vsyncpa [#allocation5], 1 }

</bundles_post_ra>
